<compile_context>
chip_gen: v6e
topology: v6e:2x2x1
jax: 0.10.0
libtpu: 0.0.40
codegen_flags: <defaults>
</compile_context>

<pallas_src>
import math
import jax
import jax.numpy as jnp
from jax.experimental import pallas as pl
from jax.experimental.pallas import tpu as pltpu

# ----- module-consistent sizes ----------------------------------------------
B = 8        # micro-batch size (one grid step)
NCTX = 8     # num_context_sample
NNEG = 8     # num_neg_sample
T = 16       # number of point feature types (enc one-hot dim)
E = 32       # embed_dim
S = 32       # spa_embed_dim (relative spatial encoder)
G = 32       # g_spa_embed_dim (global spatial encoder)
F = 8        # sinusoid frequencies -> theta width 2F=16, [theta|theta+pi/2] = 32
TWO_F = 2 * F

# ----- data slab (per micro-batch): 80 rows x 128 lanes -----------------------
# rows 0:64   lanes 0:16  ctx one-hots           lanes 16:48  rel  [theta|theta+pi/2]
# rows 64:72  lanes 0:16  center one-hots        lanes 16:48  ctr  [theta|theta+pi/2]
# rows 72:80  lanes 0:128 neg one-hots packed n-major: lane n*T+t
R_OHCT = B * NCTX + B          # 72
D_ROWS = R_OHCT + B            # 80
D_W = 128

# ----- weight slab: 112 rows x 128 lanes (lane-dense) --------------------------
# rows   0:32   lanes 0:96  [w_init_e | w_k_e*s | w_v_e]    lanes 96:128 w_o
# rows  32:64   lanes 0:96  [w_init_s | w_k_s*s | w_v_s]    lanes 96:128 w_gdec
# rows  64:96   lanes 0:64  [w_spa | w_gspa]   lanes 64:96 w_joint_1  96:128 w_joint_2
# rows  96:112  lanes 0:32  w_feat   lanes 32:64 biases(rows 0:6)   lanes 64:128 avg;mask
W_ROWS = 112
W_W = 128

OUT_W = 384                    # 3*128 lanes: pred(32) | ctr(32) | neg(256) | pad(64)
NEG_LANES = NNEG * E           # 256


# ------------------------------ the kernel -----------------------------------
def _joint_kernel(data_ref, w_ref, bd_ref, out_ref):
    f32 = jnp.float32
    dot = lambda a, b: jnp.dot(a, b, preferred_element_type=f32)

    # ---- weight row-blocks (full-lane-width loads, then value slices) --------
    blk0 = w_ref[0:32, :]                         # (32,128)
    blk1 = w_ref[32:64, :]                        # (32,128)
    blk2 = w_ref[64:96, :]                        # (32,128)
    blk3 = w_ref[96:112, :]                       # (16,128)

    w_proj_e = blk0[:, 0:3 * E];  w_o    = blk0[:, 96:128]
    w_proj_s = blk1[:, 0:3 * E];  w_gdec = blk1[:, 96:128]
    w_sin    = blk2[:, 0:64];     w_j1 = blk2[:, 64:96];  w_j2 = blk2[:, 96:128]
    w_feat   = blk3[0:T, 0:E]
    bias     = blk3[0:8, 32:64]
    avg      = blk3[0:8, 64:128]                  # (8,64) block-diag / NCTX
    mask_add = blk3[8:16, 64:128]                 # 0 on own context, -1e30 elsewhere

    b_spa, b_init, b_o = bias[0:1], bias[1:2], bias[2:3]
    b_gspa, b_gdec, b_joint = bias[3:4], bias[4:5], bias[5:6]

    # ---- data (one micro-batch tile) -----------------------------------------
    d = data_ref[...]                             # (80,128)
    oh_all = d[0:R_OHCT, 0:T]                     # (72,16)  ctx + center one-hots
    phase = d[0:R_OHCT, T:T + 2 * TWO_F]          # (72,32)  [theta | theta+pi/2]
    neg_packed = d[R_OHCT:D_ROWS, :]              # (8,128)  neg one-hots, n-major lanes

    # ---- enc(): context + center feature lookup ------------------------------
    feat_all = dot(oh_all, w_feat)                # (72,32)
    key_feat = feat_all[0:B * NCTX]               # (64,32)
    ctr_embed = feat_all[B * NCTX:R_OHCT]         # (8,32)

    # ---- spa_enc + g_spa_enc: one sin, one fused dot --------------------------
    sin_all = jnp.sin(phase)                      # (72,32) = [sin | cos] features
    spa_all = dot(sin_all, w_sin)                 # (72,64): cols 0:32 @w_spa, 32:64 @w_gspa
    key_spa = jnp.maximum(spa_all[0:B * NCTX, 0:S] + b_spa, 0.0)        # (64,32)
    g_embed = jnp.maximum(spa_all[B * NCTX:R_OHCT, S:S + G] + b_gspa, 0.0)  # (8,32)

    # ---- fused init/key/value projections (split feat/spa halves, no concat) --
    proj = dot(key_feat, w_proj_e) + dot(key_spa, w_proj_s)             # (64,96)
    # init_dec: avg @ (key @ w_init) == (mean over own context) @ w_init
    init_q = jnp.maximum(dot(avg, proj[:, 0:E]) + b_init, 0.0)          # (8,32)
    keys = proj[:, E:2 * E]                        # 1/sqrt(E) pre-folded into w_k
    vals = proj[:, 2 * E:3 * E]

    # ---- dec(): single-head attention over own-batch context ------------------
    scores = jax.lax.dot_general(init_q, keys, (((1,), (1,)), ((), ())),
                                 preferred_element_type=f32) + mask_add  # (8,64)
    m = jnp.max(scores, axis=-1, keepdims=True)
    ex = jnp.exp(scores - m)
    attn = ex * pl.reciprocal(jnp.sum(ex, axis=-1, keepdims=True), approx=True)
    ctxv = dot(attn, vals)                                               # (8,32)
    pred1 = jnp.maximum(dot(ctxv, w_o) + b_o, 0.0) + init_q              # (8,32)

    # ---- g_spa_dec + joint_dec (split-weight, concat-free) --------------------
    pred2 = jnp.maximum(dot(g_embed, w_gdec) + b_gdec, 0.0)              # (8,32)
    pred = dot(pred1, w_j1) + dot(pred2, w_j2) + b_joint                 # (8,32)

    # ---- neg embeddings: one block-diagonal (8,128)@(128,256) matmul ----------
    negblk = dot(neg_packed, bd_ref[...])                                # (8,256)

    # ---- epilogue: static lane-slice stores (no value concatenate) ------------
    out_ref[:, 0:E] = pred
    out_ref[:, E:2 * E] = ctr_embed
    out_ref[:, 2 * E:2 * E + NEG_LANES] = negblk
    out_ref[:, 2 * E + NEG_LANES:OUT_W] = jnp.zeros((B, OUT_W - 2 * E - NEG_LANES), f32)


# ------------------------------ parameters ------------------------------------
def make_params(key):
    ks = jax.random.split(key, 9)
    sc = 0.1
    return dict(
        w_feat=jax.random.normal(ks[0], (T, E), jnp.float32) * sc,
        w_spa=jax.random.normal(ks[1], (4 * F, S), jnp.float32) * sc,
        b_spa=jnp.zeros((1, S), jnp.float32),
        w_init=jax.random.normal(ks[2], (E + S, E), jnp.float32) * sc,
        b_init=jnp.zeros((1, E), jnp.float32),
        w_k=jax.random.normal(ks[3], (E + S, E), jnp.float32) * sc,
        w_v=jax.random.normal(ks[4], (E + S, E), jnp.float32) * sc,
        w_o=jax.random.normal(ks[5], (E, E), jnp.float32) * sc,
        b_o=jnp.zeros((1, E), jnp.float32),
        w_gspa=jax.random.normal(ks[6], (4 * F, G), jnp.float32) * sc,
        b_gspa=jnp.zeros((1, G), jnp.float32),
        w_gdec=jax.random.normal(ks[7], (G, E), jnp.float32) * sc,
        b_gdec=jnp.zeros((1, E), jnp.float32),
        w_joint=jax.random.normal(ks[8], (2 * E, E), jnp.float32) * sc,
        b_joint=jnp.zeros((1, E), jnp.float32),
    )


def pack_params(params):
    """Pack all weights/biases lane-dense (pre-split, pre-scaled, N-fused) into a
    (112,128) slab, plus the (128,256) block-diagonal w_feat for neg samples.
    Done once, outside the per-step path."""
    f32 = jnp.float32
    scale = 1.0 / math.sqrt(E)
    w_init, w_k, w_v = params['w_init'], params['w_k'] * scale, params['w_v']
    w_proj_e = jnp.concatenate([w_init[:E], w_k[:E], w_v[:E]], axis=1)     # (32,96)
    w_proj_s = jnp.concatenate([w_init[E:], w_k[E:], w_v[E:]], axis=1)     # (32,96)
    w_sin = jnp.concatenate([params['w_spa'], params['w_gspa']], axis=1)   # (32,64)

    bias = jnp.concatenate(
        [params['b_spa'], params['b_init'], params['b_o'],
         params['b_gspa'], params['b_gdec'], params['b_joint'],
         jnp.zeros((2, E), f32)], axis=0)                                  # (8,32)

    avg = jnp.kron(jnp.eye(B, dtype=f32),
                   jnp.ones((1, NCTX), f32)) / NCTX                        # (8,64)
    mask_add = jnp.where(avg > 0, jnp.float32(0.0), jnp.float32(-1e30))    # (8,64)

    blk0 = jnp.concatenate([w_proj_e, params['w_o']], axis=1)              # (32,128)
    blk1 = jnp.concatenate([w_proj_s, params['w_gdec']], axis=1)           # (32,128)
    blk2 = jnp.concatenate([w_sin, params['w_joint'][:E], params['w_joint'][E:]],
                           axis=1)                                         # (32,128)
    blk3 = jnp.concatenate([
        params['w_feat'],                                                  # (16,32)
        jnp.concatenate([bias, jnp.zeros((8, E), f32)], axis=0),           # (16,32)
        jnp.concatenate([avg, mask_add], axis=0),                          # (16,64)
    ], axis=1)                                                             # (16,128)
    w_slab = jnp.concatenate([blk0, blk1, blk2, blk3], axis=0)
    assert w_slab.shape == (W_ROWS, W_W)

    w_negbd = jnp.kron(jnp.eye(NNEG, dtype=f32), params['w_feat'])         # (128,256)
    assert w_negbd.shape == (NNEG * T, NNEG * E)
    return w_slab, w_negbd


def _freq_expand(coords):
    """coords (..., 2) -> (..., 2*F): geometric frequency ladder (plain-JAX glue)."""
    lam_min, lam_max = 1.0, 100.0
    i = jnp.arange(F, dtype=jnp.float32)
    freqs = 1.0 / (lam_min * (lam_max / lam_min) ** (i / max(F - 1, 1)))
    scaled = coords[..., :, None] * freqs                                  # (..., 2, F)
    return scaled.reshape(coords.shape[:-1] + (2 * F,))


# ------------------------------ forward wrapper --------------------------------
@jax.jit
def joint_forward(ctx_ids, ctr_ids, neg_ids, rel_coords, ctr_coords, w_slab, w_negbd):
    """ctx_ids (TB,NCTX) int32, ctr_ids (TB,), neg_ids (TB,NNEG),
       rel_coords (TB,NCTX,2), ctr_coords (TB,1,2); TB must be a multiple of B=8."""
    f32 = jnp.float32
    TB = ctx_ids.shape[0]
    NB = TB // B

    # host-side one-hot / phase assembly (one fused XLA prologue per call)
    ctx_oh = jax.nn.one_hot(ctx_ids, T, dtype=f32)                         # (TB,NCTX,16)
    ctr_oh = jax.nn.one_hot(ctr_ids, T, dtype=f32)                         # (TB,16)
    neg_oh = jax.nn.one_hot(neg_ids, T, dtype=f32).reshape(TB, NNEG * T)   # (TB,128)

    rel_theta = _freq_expand(rel_coords)                                   # (TB,NCTX,16)
    ctr_theta = _freq_expand(ctr_coords[:, 0, :])                          # (TB,16)
    half_pi = jnp.float32(math.pi / 2)

    ctx_rows = jnp.concatenate(
        [ctx_oh, rel_theta, rel_theta + half_pi,
         jnp.zeros((TB, NCTX, D_W - T - 2 * TWO_F), f32)], axis=-1)        # (TB,NCTX,128)
    ctr_rows = jnp.concatenate(
        [ctr_oh, ctr_theta, ctr_theta + half_pi,
         jnp.zeros((TB, D_W - T - 2 * TWO_F), f32)], axis=-1)              # (TB,128)

    data = jnp.concatenate(
        [ctx_rows.reshape(NB, B * NCTX, D_W),
         ctr_rows.reshape(NB, B, D_W),
         neg_oh.reshape(NB, B, D_W)], axis=1).reshape(NB * D_ROWS, D_W)    # (NB*80,128)

    out = pl.pallas_call(
        _joint_kernel,
        out_shape=jax.ShapeDtypeStruct((NB * B, OUT_W), f32),
        grid=(NB,),
        in_specs=[
            pl.BlockSpec((D_ROWS, D_W), lambda i: (i, 0)),      # per-step data tile
            pl.BlockSpec((W_ROWS, W_W), lambda i: (0, 0)),      # resident weight slab
            pl.BlockSpec((NNEG * T, NNEG * E), lambda i: (0, 0)),  # resident neg blockdiag
        ],
        out_specs=pl.BlockSpec((B, OUT_W), lambda i: (i, 0)),
        compiler_params=pltpu.CompilerParams(
            dimension_semantics=("parallel",)),
    )(data, w_slab, w_negbd)

    center_pred_embed = out[:, 0:E]
    center_embed = out[:, E:2 * E]
    neg_embeds = out[:, 2 * E:2 * E + NEG_LANES].reshape(TB, NNEG, E)
    return center_pred_embed, center_embed, neg_embeds


# ------------------------------ pure-JAX reference ------------------------------
def _reference_forward(params, ctx_ids, ctr_ids, neg_ids, rel_coords, ctr_coords):
    ctx_oh = jax.nn.one_hot(ctx_ids, T, dtype=jnp.float32)
    ctr_oh = jax.nn.one_hot(ctr_ids, T, dtype=jnp.float32)
    neg_oh = jax.nn.one_hot(neg_ids, T, dtype=jnp.float32)
    key_embeds = ctx_oh @ params['w_feat']
    ctr_embed = ctr_oh @ params['w_feat']
    neg_embeds = neg_oh @ params['w_feat']
    rel = _freq_expand(rel_coords)
    spa_feat = jnp.concatenate([jnp.sin(rel), jnp.cos(rel)], -1)
    key_spa = jax.nn.relu(spa_feat @ params['w_spa'] + params['b_spa'])
    kc = jnp.concatenate([key_embeds, key_spa], -1)
    init_q = jax.nn.relu(kc.mean(axis=1) @ params['w_init'] + params['b_init'])
    keys = kc @ params['w_k']
    vals = kc @ params['w_v']
    scores = jnp.einsum('be,bke->bk', init_q, keys) / math.sqrt(E)
    attn = jax.nn.softmax(scores, axis=-1)
    ctxv = jnp.einsum('bk,bke->be', attn, vals)
    pred1 = jax.nn.relu(ctxv @ params['w_o'] + params['b_o']) + init_q
    ctrc = _freq_expand(ctr_coords[:, 0, :])
    g_feat = jnp.concatenate([jnp.sin(ctrc), jnp.cos(ctrc)], -1)
    g_embed = jax.nn.relu(g_feat @ params['w_gspa'] + params['b_gspa'])
    pred2 = jax.nn.relu(g_embed @ params['w_gdec'] + params['b_gdec'])
    pred = jnp.concatenate([pred1, pred2], -1) @ params['w_joint'] + params['b_joint']
    return pred, ctr_embed, neg_embeds


if __name__ == "__main__":
    key = jax.random.PRNGKey(0)
    k_par, k_ctx, k_ctr, k_neg, k_rel, k_abs = jax.random.split(key, 6)

    NB = 4                       # micro-batches per call
    TB = NB * B                  # total batch = 32

    params = make_params(k_par)
    w_slab, w_negbd = pack_params(params)
    ctx_ids = jax.random.randint(k_ctx, (TB, NCTX), 0, T, dtype=jnp.int32)
    ctr_ids = jax.random.randint(k_ctr, (TB,), 0, T, dtype=jnp.int32)
    neg_ids = jax.random.randint(k_neg, (TB, NNEG), 0, T, dtype=jnp.int32)
    rel_coords = jax.random.uniform(k_rel, (TB, NCTX, 2), jnp.float32, -1.0, 1.0)
    ctr_coords = jax.random.uniform(k_abs, (TB, 1, 2), jnp.float32, -50.0, 50.0)

    center_pred_embed, center_embed, neg_embeds = joint_forward(
        ctx_ids, ctr_ids, neg_ids, rel_coords, ctr_coords, w_slab, w_negbd)
    jax.block_until_ready((center_pred_embed, center_embed, neg_embeds))

    assert center_pred_embed.shape == (TB, E)
    assert center_embed.shape == (TB, E)
    assert neg_embeds.shape == (TB, NNEG, E)
    assert bool(jnp.all(jnp.isfinite(center_pred_embed)))

    # structural correctness check against a pure-JAX reference (loose tolerance:
    # approx reciprocal, phase-shift cos, and MXU/XLA f32 matmul pass differences)
    ref_pred, ref_ctr, ref_neg = _reference_forward(
        params, ctx_ids, ctr_ids, neg_ids, rel_coords, ctr_coords)
    assert float(jnp.max(jnp.abs(center_pred_embed - ref_pred))) < 5e-2
    assert float(jnp.max(jnp.abs(center_embed - ref_ctr))) < 5e-2
    assert float(jnp.max(jnp.abs(neg_embeds - ref_neg))) < 5e-2

    print("KERNEL_OK")
</pallas_src>

<mosaic_0001>
module attributes {stable_mosaic.version = 11 : i64} {
  func.func @_joint_kernel(%arg0: i32, %arg1: memref<80x128xf32, #tpu.memory_space<vmem>>, %arg2: memref<112x128xf32, #tpu.memory_space<vmem>>, %arg3: memref<128x256xf32, #tpu.memory_space<vmem>>, %arg4: memref<8x384xf32, #tpu.memory_space<vmem>>) attributes {dimension_semantics = [#tpu.dimension_semantics<parallel>], iteration_bounds = array<i64: 4>, scalar_prefetch = 0 : i64, scratch_operands = 0 : i64, tpu.core_type = #tpu.core_type<tc>, window_params = [{transform_indices = @transform_0, window_bounds = array<i64: 80, 128>}, {pipeline_mode = #tpu.pipeline_mode<synchronous>, transform_indices = @transform_1, window_bounds = array<i64: 112, 128>}, {pipeline_mode = #tpu.pipeline_mode<synchronous>, transform_indices = @transform_2, window_bounds = array<i64: 128, 256>}, {transform_indices = @transform_3, window_bounds = array<i64: 8, 384>}]} {
    %c0 = arith.constant 0 : index
    %c0_0 = arith.constant 0 : index
    %0 = vector.load %arg2[%c0, %c0_0] : memref<112x128xf32, #tpu.memory_space<vmem>>, vector<32x128xf32>
    %c32 = arith.constant 32 : index
    %c0_1 = arith.constant 0 : index
    %1 = vector.load %arg2[%c32, %c0_1] : memref<112x128xf32, #tpu.memory_space<vmem>>, vector<32x128xf32>
    %c64 = arith.constant 64 : index
    %c0_2 = arith.constant 0 : index
    %2 = vector.load %arg2[%c64, %c0_2] : memref<112x128xf32, #tpu.memory_space<vmem>>, vector<32x128xf32>
    %c96 = arith.constant 96 : index
    %c0_3 = arith.constant 0 : index
    %3 = vector.load %arg2[%c96, %c0_3] : memref<112x128xf32, #tpu.memory_space<vmem>>, vector<16x128xf32>
    %4 = vector.extract_strided_slice %0 {offsets = [0, 0], sizes = [32, 96], strides = [1, 1]} : vector<32x128xf32> to vector<32x96xf32>
    %5 = vector.extract_strided_slice %0 {offsets = [0, 96], sizes = [32, 32], strides = [1, 1]} : vector<32x128xf32> to vector<32x32xf32>
    %6 = vector.extract_strided_slice %1 {offsets = [0, 0], sizes = [32, 96], strides = [1, 1]} : vector<32x128xf32> to vector<32x96xf32>
    %7 = vector.extract_strided_slice %1 {offsets = [0, 96], sizes = [32, 32], strides = [1, 1]} : vector<32x128xf32> to vector<32x32xf32>
    %8 = vector.extract_strided_slice %2 {offsets = [0, 0], sizes = [32, 64], strides = [1, 1]} : vector<32x128xf32> to vector<32x64xf32>
    %9 = vector.extract_strided_slice %2 {offsets = [0, 64], sizes = [32, 32], strides = [1, 1]} : vector<32x128xf32> to vector<32x32xf32>
    %10 = vector.extract_strided_slice %2 {offsets = [0, 96], sizes = [32, 32], strides = [1, 1]} : vector<32x128xf32> to vector<32x32xf32>
    %11 = vector.extract_strided_slice %3 {offsets = [0, 0], sizes = [16, 32], strides = [1, 1]} : vector<16x128xf32> to vector<16x32xf32>
    %12 = vector.extract_strided_slice %3 {offsets = [0, 32], sizes = [8, 32], strides = [1, 1]} : vector<16x128xf32> to vector<8x32xf32>
    %13 = vector.extract_strided_slice %3 {offsets = [0, 64], sizes = [8, 64], strides = [1, 1]} : vector<16x128xf32> to vector<8x64xf32>
    %14 = vector.extract_strided_slice %3 {offsets = [8, 64], sizes = [8, 64], strides = [1, 1]} : vector<16x128xf32> to vector<8x64xf32>
    %15 = vector.extract_strided_slice %12 {offsets = [0, 0], sizes = [1, 32], strides = [1, 1]} : vector<8x32xf32> to vector<1x32xf32>
    %16 = vector.extract_strided_slice %12 {offsets = [1, 0], sizes = [1, 32], strides = [1, 1]} : vector<8x32xf32> to vector<1x32xf32>
    %17 = vector.extract_strided_slice %12 {offsets = [2, 0], sizes = [1, 32], strides = [1, 1]} : vector<8x32xf32> to vector<1x32xf32>
    %18 = vector.extract_strided_slice %12 {offsets = [3, 0], sizes = [1, 32], strides = [1, 1]} : vector<8x32xf32> to vector<1x32xf32>
    %19 = vector.extract_strided_slice %12 {offsets = [4, 0], sizes = [1, 32], strides = [1, 1]} : vector<8x32xf32> to vector<1x32xf32>
    %20 = vector.extract_strided_slice %12 {offsets = [5, 0], sizes = [1, 32], strides = [1, 1]} : vector<8x32xf32> to vector<1x32xf32>
    %c0_4 = arith.constant 0 : index
    %c0_5 = arith.constant 0 : index
    %21 = vector.load %arg1[%c0_4, %c0_5] : memref<80x128xf32, #tpu.memory_space<vmem>>, vector<80x128xf32>
    %22 = vector.extract_strided_slice %21 {offsets = [0, 0], sizes = [72, 16], strides = [1, 1]} : vector<80x128xf32> to vector<72x16xf32>
    %23 = vector.extract_strided_slice %21 {offsets = [0, 16], sizes = [72, 32], strides = [1, 1]} : vector<80x128xf32> to vector<72x32xf32>
    %24 = vector.extract_strided_slice %21 {offsets = [72, 0], sizes = [8, 128], strides = [1, 1]} : vector<80x128xf32> to vector<8x128xf32>
    %cst = arith.constant dense<0.000000e+00> : vector<72x32xf32>
    %25 = tpu.matmul %22, %11, %cst {dimension_numbers = #tpu.dot_dimension_numbers<[1], [0], [0], [1], [0, 0, 1, 1], [], []>} : vector<72x16xf32>, vector<16x32xf32>, vector<72x32xf32> -> vector<72x32xf32>
    %26 = vector.extract_strided_slice %25 {offsets = [0, 0], sizes = [64, 32], strides = [1, 1]} : vector<72x32xf32> to vector<64x32xf32>
    %27 = vector.extract_strided_slice %25 {offsets = [64, 0], sizes = [8, 32], strides = [1, 1]} : vector<72x32xf32> to vector<8x32xf32>
    %28 = math.sin %23 : vector<72x32xf32>
    %cst_6 = arith.constant dense<0.000000e+00> : vector<72x64xf32>
    %29 = tpu.matmul %28, %8, %cst_6 {dimension_numbers = #tpu.dot_dimension_numbers<[1], [0], [0], [1], [0, 0, 1, 1], [], []>} : vector<72x32xf32>, vector<32x64xf32>, vector<72x64xf32> -> vector<72x64xf32>
    %30 = vector.extract_strided_slice %29 {offsets = [0, 0], sizes = [64, 32], strides = [1, 1]} : vector<72x64xf32> to vector<64x32xf32>
    %31 = vector.broadcast %15 : vector<1x32xf32> to vector<64x32xf32>
    %32 = arith.addf %30, %31 : vector<64x32xf32>
    %cst_7 = arith.constant 0.000000e+00 : f32
    %33 = vector.broadcast %cst_7 : f32 to vector<64x32xf32>
    %34 = arith.maximumf %32, %33 : vector<64x32xf32>
    %35 = vector.extract_strided_slice %29 {offsets = [64, 32], sizes = [8, 32], strides = [1, 1]} : vector<72x64xf32> to vector<8x32xf32>
    %36 = vector.broadcast %18 : vector<1x32xf32> to vector<8x32xf32>
    %37 = arith.addf %35, %36 : vector<8x32xf32>
    %cst_8 = arith.constant 0.000000e+00 : f32
    %38 = vector.broadcast %cst_8 : f32 to vector<8x32xf32>
    %39 = arith.maximumf %37, %38 : vector<8x32xf32>
    %cst_9 = arith.constant dense<0.000000e+00> : vector<64x96xf32>
    %40 = tpu.matmul %26, %4, %cst_9 {dimension_numbers = #tpu.dot_dimension_numbers<[1], [0], [0], [1], [0, 0, 1, 1], [], []>} : vector<64x32xf32>, vector<32x96xf32>, vector<64x96xf32> -> vector<64x96xf32>
    %cst_10 = arith.constant dense<0.000000e+00> : vector<64x96xf32>
    %41 = tpu.matmul %34, %6, %cst_10 {dimension_numbers = #tpu.dot_dimension_numbers<[1], [0], [0], [1], [0, 0, 1, 1], [], []>} : vector<64x32xf32>, vector<32x96xf32>, vector<64x96xf32> -> vector<64x96xf32>
    %42 = arith.addf %40, %41 : vector<64x96xf32>
    %43 = vector.extract_strided_slice %42 {offsets = [0, 0], sizes = [64, 32], strides = [1, 1]} : vector<64x96xf32> to vector<64x32xf32>
    %cst_11 = arith.constant dense<0.000000e+00> : vector<8x32xf32>
    %44 = tpu.matmul %13, %43, %cst_11 {dimension_numbers = #tpu.dot_dimension_numbers<[1], [0], [0], [1], [0, 0, 1, 1], [], []>} : vector<8x64xf32>, vector<64x32xf32>, vector<8x32xf32> -> vector<8x32xf32>
    %45 = vector.broadcast %16 : vector<1x32xf32> to vector<8x32xf32>
    %46 = arith.addf %44, %45 : vector<8x32xf32>
    %cst_12 = arith.constant 0.000000e+00 : f32
    %47 = vector.broadcast %cst_12 : f32 to vector<8x32xf32>
    %48 = arith.maximumf %46, %47 : vector<8x32xf32>
    %49 = vector.extract_strided_slice %42 {offsets = [0, 32], sizes = [64, 32], strides = [1, 1]} : vector<64x96xf32> to vector<64x32xf32>
    %50 = vector.extract_strided_slice %42 {offsets = [0, 64], sizes = [64, 32], strides = [1, 1]} : vector<64x96xf32> to vector<64x32xf32>
    %cst_13 = arith.constant dense<0.000000e+00> : vector<8x64xf32>
    %51 = tpu.matmul %48, %49, %cst_13 {dimension_numbers = #tpu.dot_dimension_numbers<[1], [1], [0], [0], [0, 0, 1, 0], [], []>} : vector<8x32xf32>, vector<64x32xf32>, vector<8x64xf32> -> vector<8x64xf32>
    %52 = arith.addf %51, %14 : vector<8x64xf32>
    %cst_14 = arith.constant dense<0xFF800000> : vector<8xf32>
    %53 = vector.multi_reduction <maximumf>, %52, %cst_14 [1] : vector<8x64xf32> to vector<8xf32>
    %54 = vector.shape_cast %53 : vector<8xf32> to vector<8x1xf32>
    %55 = vector.broadcast %54 : vector<8x1xf32> to vector<8x64xf32>
    %56 = arith.subf %52, %55 : vector<8x64xf32>
    %57 = math.exp %56 : vector<8x64xf32>
    %cst_15 = arith.constant dense<0.000000e+00> : vector<8xf32>
    %58 = vector.multi_reduction <add>, %57, %cst_15 [1] : vector<8x64xf32> to vector<8xf32>
    %59 = vector.shape_cast %58 : vector<8xf32> to vector<8x1xf32>
    %60 = tpu.reciprocal %59 {approx = true} : vector<8x1xf32> -> vector<8x1xf32>
    %61 = vector.broadcast %60 : vector<8x1xf32> to vector<8x64xf32>
    %62 = arith.mulf %57, %61 : vector<8x64xf32>
    %cst_16 = arith.constant dense<0.000000e+00> : vector<8x32xf32>
    %63 = tpu.matmul %62, %50, %cst_16 {dimension_numbers = #tpu.dot_dimension_numbers<[1], [0], [0], [1], [0, 0, 1, 1], [], []>} : vector<8x64xf32>, vector<64x32xf32>, vector<8x32xf32> -> vector<8x32xf32>
    %cst_17 = arith.constant dense<0.000000e+00> : vector<8x32xf32>
    %64 = tpu.matmul %63, %5, %cst_17 {dimension_numbers = #tpu.dot_dimension_numbers<[1], [0], [0], [1], [0, 0, 1, 1], [], []>} : vector<8x32xf32>, vector<32x32xf32>, vector<8x32xf32> -> vector<8x32xf32>
    %65 = vector.broadcast %17 : vector<1x32xf32> to vector<8x32xf32>
    %66 = arith.addf %64, %65 : vector<8x32xf32>
    %cst_18 = arith.constant 0.000000e+00 : f32
    %67 = vector.broadcast %cst_18 : f32 to vector<8x32xf32>
    %68 = arith.maximumf %66, %67 : vector<8x32xf32>
    %69 = arith.addf %68, %48 : vector<8x32xf32>
    %cst_19 = arith.constant dense<0.000000e+00> : vector<8x32xf32>
    %70 = tpu.matmul %39, %7, %cst_19 {dimension_numbers = #tpu.dot_dimension_numbers<[1], [0], [0], [1], [0, 0, 1, 1], [], []>} : vector<8x32xf32>, vector<32x32xf32>, vector<8x32xf32> -> vector<8x32xf32>
    %71 = vector.broadcast %19 : vector<1x32xf32> to vector<8x32xf32>
    %72 = arith.addf %70, %71 : vector<8x32xf32>
    %cst_20 = arith.constant 0.000000e+00 : f32
    %73 = vector.broadcast %cst_20 : f32 to vector<8x32xf32>
    %74 = arith.maximumf %72, %73 : vector<8x32xf32>
    %cst_21 = arith.constant dense<0.000000e+00> : vector<8x32xf32>
    %75 = tpu.matmul %69, %9, %cst_21 {dimension_numbers = #tpu.dot_dimension_numbers<[1], [0], [0], [1], [0, 0, 1, 1], [], []>} : vector<8x32xf32>, vector<32x32xf32>, vector<8x32xf32> -> vector<8x32xf32>
    %cst_22 = arith.constant dense<0.000000e+00> : vector<8x32xf32>
    %76 = tpu.matmul %74, %10, %cst_22 {dimension_numbers = #tpu.dot_dimension_numbers<[1], [0], [0], [1], [0, 0, 1, 1], [], []>} : vector<8x32xf32>, vector<32x32xf32>, vector<8x32xf32> -> vector<8x32xf32>
    %77 = arith.addf %75, %76 : vector<8x32xf32>
    %78 = vector.broadcast %20 : vector<1x32xf32> to vector<8x32xf32>
    %79 = arith.addf %77, %78 : vector<8x32xf32>
    %c0_23 = arith.constant 0 : index
    %c0_24 = arith.constant 0 : index
    %80 = vector.load %arg3[%c0_23, %c0_24] : memref<128x256xf32, #tpu.memory_space<vmem>>, vector<128x256xf32>
    %cst_25 = arith.constant dense<0.000000e+00> : vector<8x256xf32>
    %81 = tpu.matmul %24, %80, %cst_25 {dimension_numbers = #tpu.dot_dimension_numbers<[1], [0], [0], [1], [0, 0, 1, 1], [], []>} : vector<8x128xf32>, vector<128x256xf32>, vector<8x256xf32> -> vector<8x256xf32>
    %c0_26 = arith.constant 0 : index
    %c0_27 = arith.constant 0 : index
    %82 = vector.load %arg4[%c0_26, %c0_27] : memref<8x384xf32, #tpu.memory_space<vmem>>, vector<8x32xf32>
    tpu.vector_store %arg4[%c0_26, %c0_27], %79 {strides = array<i32>} : memref<8x384xf32, #tpu.memory_space<vmem>>, vector<8x32xf32>,
    %c0_28 = arith.constant 0 : index
    %c32_29 = arith.constant 32 : index
    %83 = vector.load %arg4[%c0_28, %c32_29] : memref<8x384xf32, #tpu.memory_space<vmem>>, vector<8x32xf32>
    tpu.vector_store %arg4[%c0_28, %c32_29], %27 {strides = array<i32>} : memref<8x384xf32, #tpu.memory_space<vmem>>, vector<8x32xf32>,
    %c0_30 = arith.constant 0 : index
    %c64_31 = arith.constant 64 : index
    %84 = vector.load %arg4[%c0_30, %c64_31] : memref<8x384xf32, #tpu.memory_space<vmem>>, vector<8x256xf32>
    tpu.vector_store %arg4[%c0_30, %c64_31], %81 {strides = array<i32>} : memref<8x384xf32, #tpu.memory_space<vmem>>, vector<8x256xf32>,
    %cst_32 = arith.constant 0.000000e+00 : f32
    %85 = vector.broadcast %cst_32 : f32 to vector<8x64xf32>
    %c0_33 = arith.constant 0 : index
    %c320 = arith.constant 320 : index
    %86 = vector.load %arg4[%c0_33, %c320] : memref<8x384xf32, #tpu.memory_space<vmem>>, vector<8x64xf32>
    tpu.vector_store %arg4[%c0_33, %c320], %85 {strides = array<i32>} : memref<8x384xf32, #tpu.memory_space<vmem>>, vector<8x64xf32>,
    return
  }
  func.func @transform_0(%arg0: i32) -> (i32, i32) {
    %c0_i32 = arith.constant 0 : i32
    %c0_i32_0 = arith.constant 0 : i32
    return %arg0, %c0_i32 : i32, i32
  }
  func.func @transform_1(%arg0: i32) -> (i32, i32) {
    %c0_i32 = arith.constant 0 : i32
    %c0_i32_0 = arith.constant 0 : i32
    %c0_i32_1 = arith.constant 0 : i32
    return %c0_i32, %c0_i32_0 : i32, i32
  }
  func.func @transform_2(%arg0: i32) -> (i32, i32) {
    %c0_i32 = arith.constant 0 : i32
    %c0_i32_0 = arith.constant 0 : i32
    %c0_i32_1 = arith.constant 0 : i32
    return %c0_i32, %c0_i32_0 : i32, i32
  }
  func.func @transform_3(%arg0: i32) -> (i32, i32) {
    %c0_i32 = arith.constant 0 : i32
    %c0_i32_0 = arith.constant 0 : i32
    return %arg0, %c0_i32 : i32, i32
  }
}

</mosaic_0001>

<bundles_post_ra>
// kernel: joint_forward.1
= control target key start
LH: loop header
LB: loop body
LE: loop exit
PB: predicated region body
PF: predicated region fallthrough
CT: control target
= control target key end

     0   :  { %s3134_s12 = smov 0   ;;  %s4395_s0 = inlined_call_operand.vmem [shape: f32[320,128], index: 0, kind: input, shape index: {}]   ;;  %s4396_s1 = inlined_call_operand.vmem [shape: f32[112,128], index: 1, kind: input, shape index: {}]   ;;  %s4397_s2 = inlined_call_operand.vmem [shape: f32[128,256], index: 2, kind: input, shape index: {}]   ;;  %s4398_s3 = inlined_call_operand.vmem [shape: f32[32,384], index: 3, kind: output, shape index: {}]  }
   0x1 LB: > { %s3140_s13 = sadd.s32 4294967295, %s3100_s12   ;;  %p2591_p0 = scmp.ge.s32.totalorder %s3100_s12, 1  ;;  %s3100_s12 = sphi %s3134_s12, %s13_s12  }
   0x2   : > { %p138_p1 = scmp.lt.s32.totalorder %s3100_s12, 5 }
   0x4   : > { %p139_p2 = pnand %p2591_p0, %p138_p1 }
   0x5   : > { %s162_s14 = smul.u32 (!%p139_p2), 10, %s3140_s13  ;;  %s3108_s19 = smov (!%p139_p2), 112  }
   0x6   : > { %142 = sbr.rel (%p139_p2) target bundleno = 2076 (0x81c), region = 32  ;;  %s3111_s9 = smov (!%p139_p2), 96  }
   0x7   : > { %p163_p3 = scmp.lt.s32.totalorder (!%p139_p2), %s162_s14, 39  ;;  %s3112_s25 = smov (!%p139_p2), 64  }
   0x8   : > { %s3113_s30 = smov (!%p139_p2), 32   ;;  %p168_p4 = scmp.lt.s32.totalorder (!%p139_p2), %s3140_s13, 3 }
   0xb   : > { %s4414_s14 = smov (!%p163_p3, %s162_s14), 39  ;;  %v3102_v30 = vmov 683565275   ;;  %v3103_v32 = vmov 2475754826   ;;  %s4416_s13 = smov (!%p168_p4, %s3140_s13), 3 }
   0xc   : > { %s2592_s15 = sshll.u32 %s4414_s14, 3  ;;  %v3104_v34 = vmov 2131351028   ;;  %v3105_v36 = vmov 2102212464  }
   0xd   : > { %s3148_s18 = scalar_lea.vmem %s4395_s0, %s2592_s15  ;;  %v3106_v38 = vmov 920167782   ;;  %v3107_v46 = vmov 1326507024  }
   0xe   : > { %v3151_v0 = vld [vmem:[%s3148_s18] sm:$0xff]  ;;  %v3154_v1 = vld [vmem:[%s3148_s18 + $0x8] sm:$0xff]  ;;  %v3159_v4 = vld [vmem:[%s3148_s18 + $0x10] sm:$0xff] }
   0xf   : > { %v335_v2 = vand.u32 2147483647, %v3151_v0  ;;  %v338_v3 = vand.u32 2139095040, %v3151_v0  ;;  %v439_v5 = vand.u32 2147483647, %v3154_v1  ;;  %v442_v6 = vand.u32 2139095040, %v3154_v1 }
  0x10   : > { %v546_v11 = vand.u32 2139095040, %v3159_v4  ;;  %v543_v24 = vand.u32 2147483647, %v3159_v4  ;;  %vm337_vm14 = vcmp.lt.s32.totalorder %v3151_v0, 0 }
  0x11   : > { %v339_v7 = vshrl.u32 %v338_v3, 23  ;;  %v342_v8 = vand.u32 8388607, %v335_v2  ;;  %v443_v9 = vshrl.u32 %v442_v6, 23  ;;  %v446_v10 = vand.u32 8388607, %v439_v5 }
  0x12   : > { %v547_v14 = vshrl.u32 %v546_v11, 23 }
  0x13   : > { %v2603_v12 = vadd.s32 4294967169, %v339_v7  ;;  %v2607_v13 = vadd.s32 4294967169, %v443_v9  ;;  %v343_v16 = vor.u32 8388608, %v342_v8  ;;  %v447_v17 = vor.u32 8388608, %v446_v10 }
  0x14   : > { %v2611_v19 = vadd.s32 4294967169, %v547_v14 }
  0x15   : > { %v345_v15 = vadd.s32 1, %v2603_v12  ;;  %v449_v18 = vadd.s32 1, %v2607_v13  ;;  %v3169_v25 = vshll.u32 %v343_v16, 8  ;;  %v3171_v27 = vshll.u32 %v447_v17, 8 }
  0x16   : > { %v3173_v28 = vadd.s32 1, %v2611_v19 }
  0x17   : > { %vm346_vm0 = vcmp.gt.s32.totalorder %v345_v15, 0  ;;  %vm450_vm1 = vcmp.gt.s32.totalorder %v449_v18, 0 }
  0x18   : > { %v347_v20 = vsel %vm346_vm0, %v345_v15, 0  ;;  %v451_v23 = vsel %vm450_vm1, %v449_v18, 0  ;;  %vm554_vm6 = vcmp.gt.s32.totalorder %v3173_v28, 0 }
  0x19   : > { %v348_v21 = vshrl.u32 %v347_v20, 5  ;;  %v349_v22 = vand.u32 31, %v347_v20  ;;  %v453_v26 = vand.u32 31, %v451_v23  ;;  %v3180_v40 = vshrl.u32 %v451_v23, 5 }
  0x1b   : > { %v350_v29 = vsub.s32 32, %v349_v22  ;;  %v352_v31 = vshll.u32 %v3102_v30, %v349_v22  ;;  %v355_v33 = vshll.u32 %v3103_v32, %v349_v22  ;;  %v358_v35 = vshll.u32 %v3104_v34, %v349_v22 }
  0x1c   : > { %v361_v37 = vshll.u32 %v3105_v36, %v349_v22  ;;  %v364_v39 = vshll.u32 %v3106_v38, %v349_v22  ;;  %vm367_vm2 = vcmp.lt.s32.totalorder %v348_v21, 1  ;;  %vm368_vm3 = vcmp.lt.s32.totalorder %v348_v21, 2 }
  0x1d   : > { %v351_v41 = vshrl.u32 %v3102_v30, %v350_v29  ;;  %v353_v42 = vshrl.u32 %v3103_v32, %v350_v29  ;;  %v356_v43 = vshrl.u32 %v3104_v34, %v350_v29  ;;  %v359_v44 = vshrl.u32 %v3105_v36, %v350_v29 }
  0x1e   : > { %v362_v45 = vshrl.u32 %v3106_v38, %v350_v29  ;;  %v365_v47 = vshrl.u32 %v3107_v46, %v350_v29  ;;  %vm370_vm4 = vcmp.lt.s32.totalorder %v348_v21, 4  ;;  %v454_v51 = vsub.s32 32, %v453_v26 }
  0x1f   : > { %v354_v48 = vor.u32 %v353_v42, %v352_v31  ;;  %v357_v49 = vor.u32 %v356_v43, %v355_v33  ;;  %v360_v50 = vor.u32 %v359_v44, %v358_v35  ;;  %vm369_vm5 = vcmp.lt.s32.totalorder %v348_v21, 3 }
  0x20   : > { %v363_v52 = vor.u32 %v362_v45, %v361_v37  ;;  %v366_v53 = vor.u32 %v365_v47, %v364_v39  ;;  %v456_v54 = vshll.u32 %v3102_v30, %v453_v26  ;;  %v459_v62 = vshll.u32 %v3103_v32, %v453_v26 }
  0x21   : > { %v371_v55 = vsel %vm367_vm2, %v351_v41, %v354_v48  ;;  %v372_v56 = vsel %vm370_vm4, %v360_v50, 2102212464  ;;  %v375_v57 = vsel %vm367_vm2, %v354_v48, %v357_v49  ;;  %v379_v58 = vsel %vm367_vm2, %v357_v49, %v360_v50 }
  0x22   : > { %v373_v59 = vsel %vm369_vm5, %v357_v49, %v372_v56  ;;  %v376_v60 = vsel %vm370_vm4, %v363_v52, 920167782  ;;  %v380_v61 = vsel %vm370_vm4, %v366_v53, 1326507024  ;;  %v455_v6 = vshrl.u32 %v3102_v30, %v454_v51 }
  0x23   : > { %v377_v63 = vsel %vm369_vm5, %v360_v50, %v376_v60  ;;  %v381_v3 = vsel %vm369_vm5, %v363_v52, %v380_v61  ;;  %v457_v7 = vshrl.u32 %v3103_v32, %v454_v51  ;;  %v374_v8 = vsel %vm368_vm3, %v371_v55, %v373_v59 }
  0x24   : > { %v378_v9 = vsel %vm368_vm3, %v375_v57, %v377_v63  ;;  %v382_v10 = vsel %vm368_vm3, %v379_v58, %v381_v3  ;;  %v460_v11 = vshrl.u32 %v3104_v34, %v454_v51  ;;  %v462_v18 = vshll.u32 %v3104_v34, %v453_v26 }
  0x25   : > { %v3201_v12 = vmul.u32.u64.low %v3169_v25, %v382_v10  ;;  %v3202_v13 = vmul.u32.u64.high %v3169_v25, %v382_v10, %v3201_v12  ;;  %v3205_v14 = vmul.u32.u64.low %v3169_v25, %v378_v9  ;;  %v3206_v15 = vmul.u32.u64.high %v3169_v25, %v378_v9, %v3205_v14 }
  0x26   : > { %v458_v16 = vor.u32 %v457_v7, %v456_v54  ;;  %v461_v17 = vor.u32 %v460_v11, %v459_v62  ;;  %v463_v19 = vshrl.u32 %v3105_v36, %v454_v51  ;;  %v465_v20 = vshll.u32 %v3105_v36, %v453_v26 }
  0x27   : > { %v466_v21 = vshrl.u32 %v3106_v38, %v454_v51  ;;  %v468_v22 = vshll.u32 %v3106_v38, %v453_v26  ;;  %v469_v23 = vshrl.u32 %v3107_v46, %v454_v51  ;;  %v390_v29 = vmul.u32 %v3169_v25, %v374_v8 }
  0x28   : > { %v464_v31 = vor.u32 %v463_v19, %v462_v18  ;;  %vm471_vm7 = vcmp.lt.s32.totalorder %v3180_v40, 1  ;;  %vm472_vm8 = vcmp.lt.s32.totalorder %v3180_v40, 2  ;;  %vm392_vm9 = vc.u32 %v3202_v13, %v3205_v14 }
  0x29   : > { %v393_v33 = vadd.s32 1, %v3206_v15  ;;  %v467_v35 = vor.u32 %v466_v21, %v465_v20  ;;  %vm473_vm10 = vcmp.lt.s32.totalorder %v3180_v40, 3  ;;  %v470_v37 = vor.u32 %v469_v23, %v468_v22 }
  0x2a   : > { %vm474_vm11 = vcmp.lt.s32.totalorder %v3180_v40, 4  ;;  %v475_v26 = vsel %vm471_vm7, %v455_v6, %v458_v16  ;;  %v479_v39 = vsel %vm471_vm7, %v458_v16, %v461_v17  ;;  %v483_v43 = vsel %vm471_vm7, %v461_v17, %v464_v31 }
  0x2b   : > { %v394_v25 = vsel %vm392_vm9, %v393_v33, %v3206_v15  ;;  %v476_v41 = vsel %vm474_vm11, %v464_v31, 2102212464  ;;  %v480_v42 = vsel %vm474_vm11, %v467_v35, 920167782  ;;  %v484_v48 = vsel %vm474_vm11, %v470_v37, 1326507024 }
  0x2c   : > { %v395_v44 = vadd.s32 %v394_v25, %v390_v29  ;;  %v477_v45 = vsel %vm473_vm10, %v461_v17, %v476_v41  ;;  %v481_v47 = vsel %vm473_vm10, %v464_v31, %v480_v42  ;;  %v485_v51 = vsel %vm473_vm10, %v467_v35, %v484_v48 }
  0x2d   : > { %v478_v49 = vsel %vm472_vm8, %v475_v26, %v477_v45  ;;  %v482_v50 = vsel %vm472_vm8, %v479_v39, %v481_v47  ;;  %v555_v52 = vsel %vm554_vm6, %v3173_v28, 0  ;;  %v486_v54 = vsel %vm472_vm8, %v483_v43, %v485_v51  ;;  %v3247_v28 = vld [vmem:[%s3148_s18 + $0x18] sm:$0xff] }
  0x2e   : > { %v396_v53 = vadd.s32 536870912, %v395_v44  ;;  %v3234_v55 = vmul.u32.u64.low %v3171_v27, %v482_v50  ;;  %v3235_v56 = vmul.u32.u64.high %v3171_v27, %v482_v50, %v3234_v55  ;;  %v550_v59 = vand.u32 8388607, %v543_v24 }
  0x2f   : > { %v3239_v57 = vmul.u32.u64.low %v3171_v27, %v486_v54  ;;  %v3240_v58 = vmul.u32.u64.high %v3171_v27, %v486_v54, %v3239_v57  ;;  %v557_v61 = vand.u32 31, %v555_v52  ;;  %v494_v40 = vmul.u32 %v3171_v27, %v478_v49 }
  0x30   : > { %v3244_v60 = vshrl.u32 %v396_v53, 30  ;;  %v497_v63 = vadd.s32 1, %v3235_v56  ;;  %v551_v6 = vor.u32 8388608, %v550_v59  ;;  %v650_v7 = vand.u32 2139095040, %v3247_v28 }
  0x31   : > { %v558_v3 = vsub.s32 32, %v557_v61  ;;  %vm496_vm12 = vc.u32 %v3240_v58, %v3234_v55  ;;  %v3258_v10 = vshrl.u32 %v555_v52, 5  ;;  %v647_v11 = vand.u32 2147483647, %v3247_v28 }
  0x32   : > { %v398_v62 = vshll.u32 %v3244_v60, 30  ;;  %v498_v9 = vsel %vm496_vm12, %v497_v63, %v3235_v56  ;;  %v560_v12 = vshll.u32 %v3102_v30, %v557_v61  ;;  %v563_v16 = vshll.u32 %v3103_v32, %v557_v61 }
  0x33   : > { %v499_v27 = vadd.s32 %v498_v9, %v494_v40  ;;  %v561_v15 = vshrl.u32 %v3103_v32, %v558_v3  ;;  %v564_v18 = vshrl.u32 %v3104_v34, %v558_v3  ;;  %v566_v19 = vshll.u32 %v3104_v34, %v557_v61 }
  0x34   : > { %v3255_v8 = vsub.s32 %v395_v44, %v398_v62  ;;  %v567_v20 = vshrl.u32 %v3105_v36, %v558_v3  ;;  %v569_v22 = vshll.u32 %v3105_v36, %v557_v61  ;;  %v3269_v23 = vshll.u32 %v551_v6, 8 }
  0x35   : > { %v500_v21 = vadd.s32 536870912, %v499_v27  ;;  %v651_v29 = vshrl.u32 %v650_v7, 23  ;;  %v391_v31 = vadd.s32 %v3205_v14, %v3202_v13  ;;  %v570_v35 = vshrl.u32 %v3106_v38, %v558_v3 }
  0x36   : > { %v401_v17 = vsub.s32 0, %v3255_v8  ;;  %vm578_vm13 = vcmp.lt.s32.totalorder %v3258_v10, 4  ;;  %v559_v26 = vshrl.u32 %v3102_v30, %v558_v3  ;;  %v572_v39 = vshll.u32 %v3106_v38, %v557_v61 }
  0x37   : > { %v3276_v37 = vshrl.u32 %v500_v21, 30  ;;  %v573_v25 = vshrl.u32 %v3107_v46, %v558_v3  ;;  %v562_v42 = vor.u32 %v561_v15, %v560_v12  ;;  %v565_v43 = vor.u32 %v564_v18, %v563_v16 }
  0x38   : > { %v2604_v33 = vmin.u32 %v401_v17, %v3255_v8  ;;  %v568_v13 = vor.u32 %v567_v20, %v566_v19  ;;  %v571_v44 = vor.u32 %v570_v35, %v569_v22  ;;  %vm575_vm15 = vcmp.lt.s32.totalorder %v3258_v10, 1 }
  0x39   : > { %v502_v14 = vshll.u32 %v3276_v37, 30  ;;  %vm577_vm0 = vcmp.lt.s32.totalorder %v3258_v10, 3  ;;  %v574_v47 = vor.u32 %v573_v25, %v572_v39  ;;  %v2615_v49 = vadd.s32 4294967169, %v651_v29 }
  0x3a   : > { %v403_v41 = vclz %v2604_v33  ;;  %v580_v48 = vsel %vm578_vm13, %v568_v13, 2102212464  ;;  %v421_v50 = vsub.s32 4, %v3244_v60  ;;  %vm576_vm1 = vcmp.lt.s32.totalorder %v3258_v10, 2 }
  0x3b   : > { %v3288_v51 = vsub.s32 %v499_v27, %v502_v14  ;;  %v584_v52 = vsel %vm578_vm13, %v571_v44, 920167782  ;;  %v579_v53 = vsel %vm575_vm15, %v559_v26, %v562_v42  ;;  %v583_v54 = vsel %vm575_vm15, %v562_v42, %v565_v43 }
  0x3c   : > { %v2605_v45 = vadd.s32 4294967294, %v403_v41  ;;  %v585_v56 = vsel %vm577_vm0, %v568_v13, %v584_v52  ;;  %v581_v61 = vsel %vm577_vm0, %v565_v43, %v580_v48  ;;  %v587_v40 = vsel %vm575_vm15, %v565_v43, %v568_v13 }
  0x3d   : > { %v505_v59 = vsub.s32 0, %v3288_v51  ;;  %v588_v6 = vsel %vm578_vm13, %v574_v47, 1326507024  ;;  %v586_v9 = vsel %vm576_vm1, %v583_v54, %v585_v56  ;;  %v3314_v12 = vand.u32 8388607, %v647_v11 }
  0x3e   : > { %vm2606_vm2 = vcmp.lt.s32.totalorder %v2605_v45, 0  ;;  %v589_v27 = vsel %vm577_vm0, %v571_v44, %v588_v6  ;;  %v657_v17 = vadd.s32 1, %v2615_v49  ;;  %vm3320_vm3 = vcmp.le.f32.partialorder %v335_v2, 0.7853982 }
  0x3f   : > { %v406_v57 = vsel %vm2606_vm2, 0, %v2605_v45  ;;  %v2608_v7 = vmin.u32 %v505_v59, %v3288_v51  ;;  %v422_v19 = vsel %vm337_vm14, %v421_v50, %v3244_v60  ;;  %v582_v21 = vsel %vm576_vm1, %v579_v53, %v581_v61 }
  0x40   : > { %v407_v62 = vsub.s32 32, %v406_v57  ;;  %v408_v63 = vshll.u32 %v3255_v8, %v406_v57  ;;  %v411_v3 = vsub.s32 4294967266, %v406_v57  ;;  %v590_v8 = vsel %vm576_vm1, %v587_v40, %v589_v27 }
  0x41   : > { %v507_v20 = vclz %v2608_v7  ;;  %v3334_v2 = vmul.u32.u64.low %v3269_v23, %v586_v9  ;;  %v3335_v26 = vmul.u32.u64.high %v3269_v23, %v586_v9, %v3334_v2  ;;  %vm658_vm4 = vcmp.gt.s32.totalorder %v657_v17, 0 }
  0x42   : > { %v409_v15 = vshrl.u32 %v391_v31, %v407_v62  ;;  %v412_v16 = vadd.s32 127, %v411_v3  ;;  %v3330_v31 = vmul.u32.u64.low %v3269_v23, %v590_v8  ;;  %v3331_v33 = vmul.u32.u64.high %v3269_v23, %v590_v8, %v3330_v31 }
  0x43   : > { %v2609_v35 = vadd.s32 4294967294, %v507_v20  ;;  %v655_v60 = vor.u32 8388608, %v3314_v12  ;;  %v659_v41 = vsel %vm658_vm4, %v657_v17, 0  ;;  %v424_v10 = vsel %vm3320_vm3, 0, %v422_v19 }
  0x44   : > { %v410_v22 = vor.u32 %v409_v15, %v408_v63  ;;  %v413_v29 = vshll.u32 %v412_v16, 23  ;;  %v495_v42 = vadd.s32 %v3234_v55, %v3240_v58  ;;  %v661_v43 = vand.u32 31, %v659_v41 }
  0x45   : > { %vm2610_vm5 = vcmp.lt.s32.totalorder %v2609_v35, 0  ;;  %v598_v44 = vmul.u32 %v3269_v23, %v582_v21  ;;  %vm600_vm6 = vc.u32 %v3331_v33, %v3334_v2  ;;  %v601_v49 = vadd.s32 1, %v3335_v26 }
  0x46   : > { %v414_v39 = vor.u32 4788187, %v413_v29  ;;  %v417_v25 = vcvt.s32.f32 %v410_v22  ;;  %v510_v14 = vsel %vm2610_vm5, 0, %v2609_v35  ;;  %v428_v52 = vadd.s32 3, %v424_v10 }
  0x47   : > { %v511_v45 = vsub.s32 32, %v510_v14  ;;  %v512_v47 = vshll.u32 %v3288_v51, %v510_v14  ;;  %v515_v48 = vsub.s32 4294967266, %v510_v14  ;;  %v3348_v53 = vshrl.u32 %v659_v41, 5 }
  0x48   : > { %v415_v13 = vand.u32 2147483647, %v414_v39  ;;  %v662_v55 = vsub.s32 32, %v661_v43  ;;  %v602_v56 = vsel %vm600_vm6, %v601_v49, %v3335_v26  ;;  %v664_v23 = vshll.u32 %v3102_v30, %v661_v43 }
  0x49   : > { %v513_v58 = vshrl.u32 %v495_v42, %v511_v45  ;;  %v516_v54 = vadd.s32 127, %v515_v48  ;;  %vm441_vm7 = vcmp.lt.s32.totalorder %v3154_v1, 0  ;;  %v603_v59 = vadd.s32 %v602_v56, %v598_v44 }
  0x4a   : > { %v418_v50 = vmul.f32 %v417_v25, %v415_v13  ;;  %v665_v51 = vshrl.u32 %v3103_v32, %v662_v55  ;;  %v667_v61 = vshll.u32 %v3103_v32, %v661_v43  ;;  %vm3357_vm8 = vcmp.le.f32.partialorder %v439_v5, 0.7853982 }
  0x4b   : > { %v514_v62 = vor.u32 %v513_v58, %v512_v47  ;;  %v517_v63 = vshll.u32 %v516_v54, 23  ;;  %v668_v3 = vshrl.u32 %v3104_v34, %v662_v55  ;;  %v670_v6 = vshll.u32 %v3104_v34, %v661_v43 }
  0x4c   : > { %v419_v57 = vxor.u32 2147483648, %v418_v50  ;;  %v604_v9 = vadd.s32 536870912, %v603_v59  ;;  %v671_v27 = vshrl.u32 %v3105_v36, %v662_v55  ;;  %v673_v12 = vshll.u32 %v3105_v36, %v661_v43 }
  0x4d   : > { %v518_v15 = vor.u32 4788187, %v517_v63  ;;  %v521_v16 = vcvt.s32.f32 %v514_v62  ;;  %v666_v8 = vor.u32 %v665_v51, %v664_v23  ;;  %v669_v19 = vor.u32 %v668_v3, %v667_v61 }
  0x4e   : > { %v420_v7 = vsel %vm337_vm14, %v419_v57, %v418_v50  ;;  %v3370_v17 = vshrl.u32 %v604_v9, 30  ;;  %v674_v20 = vshrl.u32 %v3106_v38, %v662_v55  ;;  %v676_v22 = vshll.u32 %v3106_v38, %v661_v43 }
  0x4f   : > { %v423_v5 = vsel %vm3320_vm3, %v3151_v0, %v420_v7  ;;  %v519_v21 = vand.u32 2147483647, %v518_v15  ;;  %v677_v29 = vshrl.u32 %v3107_v46, %v662_v55  ;;  %v525_v31 = vsub.s32 4, %v3276_v37 }
  0x50   : > { %3044 = vcosq.f32 %v423_v5  ;;  %v606_v18 = vshll.u32 %v3370_v17, 30  ;;  %v675_v35 = vor.u32 %v674_v20, %v673_v12  ;;  %vm679_vm9 = vcmp.lt.s32.totalorder %v3348_v53, 1 }
  0x51   : > { %3046 = vsinq.f32 %v423_v5  ;;  %v522_v26 = vmul.f32 %v521_v16, %v519_v21  ;;  %v663_v39 = vshrl.u32 %v3102_v30, %v662_v55  ;;  %v672_v25 = vor.u32 %v671_v27, %v670_v6 }
  0x52   : > { %v3379_v41 = vshll.u32 %v655_v60, 8  ;;  %v3381_v10 = vsub.s32 %v603_v59, %v606_v18  ;;  %v678_v42 = vor.u32 %v677_v29, %v676_v22  ;;  %vm681_vm10 = vcmp.lt.s32.totalorder %v3348_v53, 3  ;;  %v3422_v59 = vld [vmem:[%s3148_s18 + $0x20] sm:$0xff] }
  0x53   : > { %vm682_vm11 = vcmp.lt.s32.totalorder %v3348_v53, 4  ;;  %v523_v43 = vxor.u32 2147483648, %v522_v26  ;;  %vm680_vm12 = vcmp.lt.s32.totalorder %v3348_v53, 2  ;;  %v687_v14 = vsel %vm679_vm9, %v666_v8, %v669_v19 }
  0x54   : > { %v684_v13 = vsel %vm682_vm11, %v672_v25, 2102212464  ;;  %v429_v44 = vand.u32 3, %v428_v52  ;;  %v526_v60 = vsel %vm441_vm7, %v525_v31, %v3276_v37  ;;  %vm545_vm13 = vcmp.lt.s32.totalorder %v3159_v4, 0 }
  0x55   : > { %v609_v45 = vsub.s32 0, %v3381_v10  ;;  %v688_v47 = vsel %vm682_vm11, %v675_v35, 920167782  ;;  %v524_v48 = vsel %vm441_vm7, %v523_v43, %v522_v26  ;;  %v683_v49 = vsel %vm679_vm9, %v663_v39, %v666_v8 }
  0x56   : > { %v685_v50 = vsel %vm681_vm10, %v669_v19, %v684_v13  ;;  %v689_v37 = vsel %vm681_vm10, %v672_v25, %v688_v47  ;;  %vm427_vm14 = vweird.f32 %v3151_v0  ;;  %v527_v52 = vsel %vm3357_vm8, %v3154_v1, %v524_v48 }
  0x57   : > { %v2612_v55 = vmin.u32 %v609_v45, %v3381_v10  ;;  %v690_v58 = vsel %vm680_vm12, %v687_v14, %v689_v37  ;;  %v691_v54 = vsel %vm679_vm9, %v669_v19, %v672_v25  ;;  %3048 = vcosq.f32 %v527_v52 }
  0x58   : > { %v692_v56 = vsel %vm682_vm11, %v678_v42, 1326507024  ;;  %v3417_v23 = vmul.u32.u64.low %v3379_v41, %v690_v58  ;;  %v3418_v57 = vmul.u32.u64.high %v3379_v41, %v690_v58, %v3417_v23  ;;  %vm430_vm15 = vcmp.lt.s32.totalorder %v429_v44, 2 }
  0x59   : > { %v528_v51 = vsel %vm3357_vm8, 0, %v526_v60  ;;  %3050 = vsinq.f32 %v527_v52  ;;  %vm3428_vm0 = vcmp.le.f32.partialorder %v543_v24, 0.7853982  ;;  %v611_v62 = vclz %v2612_v55 }
  0x5a   : > { %vm431_vm1 = vcmp.eq.s32.totalorder %v429_v44, 0  ;;  %vm434_vm2 = vcmp.eq.s32.totalorder %v429_v44, 2  ;;  %v629_v63 = vsub.s32 4, %v3370_v17  ;;  %v693_v3 = vsel %vm681_vm10, %v675_v35, %v692_v56 }
  0x5b   : > { %v2613_v6 = vadd.s32 4294967294, %v611_v62  ;;  %v686_v40 = vsel %vm680_vm12, %v683_v49, %v685_v50  ;;  %v694_v7 = vsel %vm680_vm12, %v691_v54, %v693_v3  ;;  %v754_v24 = vand.u32 2139095040, %v3422_v59 }
  0x5c   : > { %v532_v27 = vadd.s32 3, %v528_v51  ;;  %v599_v12 = vadd.s32 %v3334_v2, %v3331_v33  ;;  %v3443_v5 = vmul.u32.u64.low %v3379_v41, %v694_v7  ;;  %v3444_v15 = vmul.u32.u64.high %v3379_v41, %v694_v7, %v3443_v5 }
  0x5d   : > { %v3045_v9 = vpop.eup %3044  ;;  %vm2614_vm3 = vcmp.lt.s32.totalorder %v2613_v6, 0  ;;  %v705_v19 = vadd.s32 1, %v3418_v57  ;;  %v755_v20 = vshrl.u32 %v754_v24, 23  ;;  %v630_v22 = vsel %vm545_vm13, %v629_v63, %v3370_v17 }
  0x5e   : > { %v3047_v16 = vpop.eup %3046  ;;  %v435_v8 = vxor.u32 2147483648, %v3045_v9  ;;  %v614_v53 = vsel %vm2614_vm3, 0, %v2613_v6  ;;  %v702_v29 = vmul.u32 %v3379_v41, %v686_v40  ;;  %v533_v26 = vand.u32 3, %v532_v27  ;;  %v3472_v6 = vld [vmem:[%s3148_s18 + $0x28] sm:$0xff] }
  0x5f   : > { %v432_v21 = vxor.u32 2147483648, %v3047_v16  ;;  %v615_v2 = vsub.s32 32, %v614_v53  ;;  %v616_v31 = vshll.u32 %v3381_v10, %v614_v53  ;;  %v619_v18 = vsub.s32 4294967266, %v614_v53 }
  0x60   : > { %v436_v33 = vsel %vm434_vm2, %v435_v8, %v3047_v16  ;;  %vm704_vm4 = vc.u32 %v3444_v15, %v3417_v23  ;;  %v2619_v39 = vadd.s32 4294967169, %v755_v20  ;;  %v632_v10 = vsel %vm3428_vm0, 0, %v630_v22 }
  0x61   : > { %v433_v35 = vsel %vm431_vm1, %v3045_v9, %v432_v21  ;;  %v617_v42 = vshrl.u32 %v599_v12, %v615_v2  ;;  %v620_v43 = vadd.s32 127, %v619_v18  ;;  %v706_v17 = vsel %vm704_vm4, %v705_v19, %v3418_v57 }
  0x62   : > { %v437_v25 = vsel %vm430_vm15, %v433_v35, %v436_v33  ;;  %v707_v13 = vadd.s32 %v706_v17, %v702_v29  ;;  %v761_v14 = vadd.s32 1, %v2619_v39  ;;  %vm538_vm5 = vcmp.eq.s32.totalorder %v533_v26, 2 }
  0x63   : > { %v438_v41 = vsel %vm427_vm14, nan, %v437_v25  ;;  %v618_v60 = vor.u32 %v617_v42, %v616_v31  ;;  %v621_v45 = vshll.u32 %v620_v43, 23  ;;  %v751_v47 = vand.u32 2147483647, %v3422_v59 }
  0x64   : > { %1280 = vrot.lane.b32.xlu0 %v438_v41, %s3108_s19  ;;  %v708_v44 = vadd.s32 536870912, %v707_v13  ;;  %vm762_vm6 = vcmp.gt.s32.totalorder %v761_v14, 0  ;;  %v3049_v48 = vpop.eup %3048  ;;  %v636_v0 = vadd.s32 3, %v632_v10  ;;  %vm535_vm7 = vcmp.eq.s32.totalorder %v533_v26, 0 }
  0x65   : > { %v622_v49 = vor.u32 4788187, %v621_v45  ;;  %v625_v50 = vcvt.s32.f32 %v618_v60  ;;  %v763_v37 = vsel %vm762_vm6, %v761_v14, 0  ;;  %v539_v55 = vxor.u32 2147483648, %v3049_v48 }
  0x66   : > { %v3051_v52 = vpop.eup %3050  ;;  %v3464_v58 = vshrl.u32 %v708_v44, 30  ;;  %v765_v54 = vand.u32 31, %v763_v37  ;;  %vm531_vm8 = vweird.f32 %v3154_v1  ;;  %vm534_vm9 = vcmp.lt.s32.totalorder %v533_v26, 2 }
  0x67   : > { %v536_v56 = vxor.u32 2147483648, %v3051_v52  ;;  %v623_v57 = vand.u32 2147483647, %v622_v49  ;;  %v540_v51 = vsel %vm538_vm5, %v539_v55, %v3051_v52  ;;  %v758_v63 = vand.u32 8388607, %v751_v47 }
  0x68   : > { %v710_v62 = vshll.u32 %v3464_v58, 30  ;;  %v766_v3 = vsub.s32 32, %v765_v54  ;;  %v3474_v24 = vand.u32 3, %v636_v0  ;;  %v855_v9 = vand.u32 2147483647, %v3472_v6 }
  0x69   : > { %v537_v40 = vsel %vm535_vm7, %v3049_v48, %v536_v56  ;;  %v626_v7 = vmul.f32 %v625_v50, %v623_v57  ;;  %v703_v12 = vadd.s32 %v3417_v23, %v3444_v15  ;;  %v768_v16 = vshll.u32 %v3102_v30, %v765_v54 }
  0x6a   : > { %v541_v27 = vsel %vm534_vm9, %v537_v40, %v540_v51  ;;  %v3479_v5 = vsub.s32 %v707_v13, %v710_v62  ;;  %v769_v20 = vshrl.u32 %v3103_v32, %v766_v3  ;;  %v771_v21 = vshll.u32 %v3103_v32, %v765_v54 }
  0x6b   : > { %v542_v8 = vsel %vm531_vm8, nan, %v541_v27  ;;  %v627_v19 = vxor.u32 2147483648, %v626_v7  ;;  %v759_v22 = vor.u32 8388608, %v758_v63  ;;  %v764_v29 = vshrl.u32 %v763_v37, 5 }
  0x6c   : > { %1282 = vrot.lane.b32.xlu0 %v542_v8, %s3108_s19  ;;  %v713_v53 = vsub.s32 0, %v3479_v5  ;;  %v772_v23 = vshrl.u32 %v3104_v34, %v766_v3  ;;  %v774_v33 = vshll.u32 %v3104_v34, %v765_v54  ;;  %v775_v1 = vshrl.u32 %v3105_v36, %v766_v3 }
  0x6d   : > { %v628_v15 = vsel %vm545_vm13, %v627_v19, %v626_v7  ;;  %v777_v2 = vshll.u32 %v3105_v36, %v765_v54  ;;  %v770_v35 = vor.u32 %v769_v20, %v768_v16  ;;  %v858_v26 = vand.u32 2139095040, %v3472_v6 }
  0x6e   : > { %v631_v31 = vsel %vm3428_vm0, %v3159_v4, %v628_v15  ;;  %v2616_v18 = vmin.u32 %v713_v53, %v3479_v5  ;;  %v773_v39 = vor.u32 %v772_v23, %v771_v21  ;;  %v778_v25 = vshrl.u32 %v3106_v38, %v766_v3 }
  0x6f   : > { %3052 = vcosq.f32 %v631_v31  ;;  %v780_v42 = vshll.u32 %v3106_v38, %v765_v54  ;;  %v767_v17 = vshrl.u32 %v3102_v30, %v766_v3  ;;  %v3502_v41 = vshll.u32 %v759_v22, 8 }
  0x70   : > { %3054 = vsinq.f32 %v631_v31  ;;  %v715_v43 = vclz %v2616_v18  ;;  %v776_v10 = vor.u32 %v775_v1, %v774_v33  ;;  %v779_v61 = vor.u32 %v778_v25, %v777_v2 }
  0x71   : > { %v781_v13 = vshrl.u32 %v3107_v46, %v766_v3  ;;  %vm783_vm10 = vcmp.lt.s32.totalorder %v764_v29, 1  ;;  %vm785_vm11 = vcmp.lt.s32.totalorder %v764_v29, 3  ;;  %vm786_vm12 = vcmp.lt.s32.totalorder %v764_v29, 4 }
  0x72   : > { %v2617_v14 = vadd.s32 4294967294, %v715_v43  ;;  %v859_v60 = vshrl.u32 %v858_v26, 23  ;;  %vm784_vm13 = vcmp.lt.s32.totalorder %v764_v29, 2  ;;  %v788_v44 = vsel %vm786_vm12, %v776_v10, 2102212464 }
  0x73   : > { %v782_v45 = vor.u32 %v781_v13, %v780_v42  ;;  %v791_v48 = vsel %vm783_vm10, %v770_v35, %v773_v39  ;;  %v787_v49 = vsel %vm783_vm10, %v767_v17, %v770_v35  ;;  %v789_v50 = vsel %vm785_vm11, %v773_v39, %v788_v44 }
  0x74   : > { %vm2618_vm14 = vcmp.lt.s32.totalorder %v2617_v14, 0  ;;  %v792_v0 = vsel %vm786_vm12, %v779_v61, 920167782  ;;  %v795_v55 = vsel %vm783_vm10, %v773_v39, %v776_v10  ;;  %vm635_vm15 = vweird.f32 %v3159_v4  ;;  %v3542_v39 = vld [vmem:[%s3148_s18 + $0x30] sm:$0xff] }
  0x75   : > { %v718_v37 = vsel %vm2618_vm14, 0, %v2617_v14  ;;  %v793_v52 = vsel %vm785_vm11, %v776_v10, %v792_v0  ;;  %v796_v54 = vsel %vm786_vm12, %v782_v45, 1326507024  ;;  %v790_v63 = vsel %vm784_vm13, %v787_v49, %v789_v50 }
  0x76   : > { %v719_v56 = vsub.s32 32, %v718_v37  ;;  %v720_v57 = vshll.u32 %v3479_v5, %v718_v37  ;;  %v723_v51 = vsub.s32 4294967266, %v718_v37  ;;  %v794_v62 = vsel %vm784_vm13, %v791_v48, %v793_v52 }
  0x77   : > { %v797_v3 = vsel %vm785_vm11, %v779_v61, %v796_v54  ;;  %v3513_v40 = vmul.u32.u64.low %v3502_v41, %v794_v62  ;;  %v3514_v7 = vmul.u32.u64.high %v3502_v41, %v794_v62, %v3513_v40  ;;  %v2623_v19 = vadd.s32 4294967169, %v859_v60 }
  0x78   : > { %v721_v27 = vshrl.u32 %v703_v12, %v719_v56  ;;  %v724_v16 = vadd.s32 127, %v723_v51  ;;  %v798_v8 = vsel %vm784_vm13, %v795_v55, %v797_v3  ;;  %vm3520_vm0 = vcmp.le.f32.partialorder %v647_v11, 0.7853982 }
  0x79   : > { %v733_v20 = vsub.s32 4, %v3464_v58  ;;  %v3526_v21 = vmul.u32.u64.low %v3502_v41, %v798_v8  ;;  %v3527_v53 = vmul.u32.u64.high %v3502_v41, %v798_v8, %v3526_v21  ;;  %vm649_vm1 = vcmp.lt.s32.totalorder %v3247_v28, 0 }
  0x7a   : > { %v722_v22 = vor.u32 %v721_v27, %v720_v57  ;;  %v725_v12 = vshll.u32 %v724_v16, 23  ;;  %v865_v29 = vadd.s32 1, %v2623_v19  ;;  %vm639_vm2 = vcmp.eq.s32.totalorder %v3474_v24, 0 }
  0x7b   : > { %v806_v23 = vmul.u32 %v3502_v41, %v790_v63  ;;  %v809_v11 = vadd.s32 1, %v3514_v7  ;;  %v862_v15 = vand.u32 8388607, %v855_v9  ;;  %vm642_vm3 = vcmp.eq.s32.totalorder %v3474_v24, 2 }
  0x7c   : > { %v3053_v33 = vpop.eup %3052  ;;  %v726_v1 = vor.u32 4788187, %v725_v12  ;;  %v729_v2 = vcvt.s32.f32 %v722_v22  ;;  %vm866_vm4 = vcmp.gt.s32.totalorder %v865_v29, 0  ;;  %v734_v35 = vsel %vm649_vm1, %v733_v20, %v3464_v58 }
  0x7d   : > { %v3055_v31 = vpop.eup %3054  ;;  %v643_v18 = vxor.u32 2147483648, %v3053_v33  ;;  %vm808_vm5 = vc.u32 %v3527_v53, %v3513_v40  ;;  %v867_v26 = vsel %vm866_vm4, %v865_v29, 0  ;;  %vm638_vm6 = vcmp.lt.s32.totalorder %v3474_v24, 2 }
  0x7e   : > { %v640_v25 = vxor.u32 2147483648, %v3055_v31  ;;  %v727_v42 = vand.u32 2147483647, %v726_v1  ;;  %v810_v43 = vsel %vm808_vm5, %v809_v11, %v3514_v7  ;;  %v863_v10 = vor.u32 8388608, %v862_v15 }
  0x7f   : > { %v644_v17 = vsel %vm642_vm3, %v643_v18, %v3055_v31  ;;  %v811_v41 = vadd.s32 %v810_v43, %v806_v23  ;;  %v869_v61 = vand.u32 31, %v867_v26  ;;  %v736_v14 = vsel %vm3520_vm0, 0, %v734_v35 }
  0x80   : > { %v641_v13 = vsel %vm639_vm2, %v3053_v33, %v640_v25  ;;  %v730_v58 = vmul.f32 %v729_v2, %v727_v42  ;;  %v962_v60 = vand.u32 2139095040, %v3542_v39  ;;  %v868_v48 = vshrl.u32 %v867_v26, 5 }
  0x81   : > { %v645_v45 = vsel %vm638_vm6, %v641_v13, %v644_v17  ;;  %v812_v44 = vadd.s32 536870912, %v811_v41  ;;  %v870_v49 = vsub.s32 32, %v869_v61  ;;  %v872_v37 = vshll.u32 %v3102_v30, %v869_v61 }
  0x82   : > { %v646_v50 = vsel %vm635_vm15, nan, %v645_v45  ;;  %v731_v0 = vxor.u32 2147483648, %v730_v58  ;;  %v875_v52 = vshll.u32 %v3103_v32, %v869_v61  ;;  %v878_v56 = vshll.u32 %v3104_v34, %v869_v61 }
  0x83   : > { %1284 = vrot.lane.b32.xlu1 %v646_v50, %s3108_s19  ;;  %v3556_v24 = vshrl.u32 %v812_v44, 30  ;;  %v873_v55 = vshrl.u32 %v3103_v32, %v870_v49  ;;  %v876_v54 = vshrl.u32 %v3104_v34, %v870_v49  ;;  %v879_v4 = vshrl.u32 %v3105_v36, %v870_v49 }
  0x84   : > { %v732_v57 = vsel %vm649_vm1, %v731_v0, %v730_v58  ;;  %v881_v51 = vshll.u32 %v3105_v36, %v869_v61  ;;  %v882_v62 = vshrl.u32 %v3106_v38, %v870_v49  ;;  %v871_v7 = vshrl.u32 %v3102_v30, %v870_v49 }
  0x85   : > { %v735_v63 = vsel %vm3520_vm0, %v3247_v28, %v732_v57  ;;  %v814_v3 = vshll.u32 %v3556_v24, 30  ;;  %vm887_vm7 = vcmp.lt.s32.totalorder %v868_v48, 1  ;;  %v874_v27 = vor.u32 %v873_v55, %v872_v37 }
  0x86   : > { %3056 = vcosq.f32 %v735_v63  ;;  %v877_v16 = vor.u32 %v876_v54, %v875_v52  ;;  %v883_v8 = vor.u32 %v882_v62, %v881_v51  ;;  %v880_v20 = vor.u32 %v879_v4, %v878_v56 }
  0x87   : > { %3058 = vsinq.f32 %v735_v63  ;;  %v3571_v19 = vsub.s32 %v811_v41, %v814_v3  ;;  %v884_v21 = vshll.u32 %v3106_v38, %v869_v61  ;;  %v740_v22 = vadd.s32 3, %v736_v14 }
  0x88   : > { %v885_v12 = vshrl.u32 %v3107_v46, %v870_v49  ;;  %vm889_vm8 = vcmp.lt.s32.totalorder %v868_v48, 3  ;;  %vm890_vm9 = vcmp.lt.s32.totalorder %v868_v48, 4  ;;  %vm888_vm10 = vcmp.lt.s32.totalorder %v868_v48, 2 }
  0x89   : > { %v817_v5 = vsub.s32 0, %v3571_v19  ;;  %v892_v29 = vsel %vm890_vm9, %v880_v20, 2102212464  ;;  %v903_v23 = vshll.u32 %v863_v10, 8  ;;  %v895_v15 = vsel %vm887_vm7, %v874_v27, %v877_v16 }
  0x8a   : > { %v886_v11 = vor.u32 %v885_v12, %v884_v21  ;;  %v896_v33 = vsel %vm890_vm9, %v883_v8, 920167782  ;;  %v963_v1 = vshrl.u32 %v962_v60, 23  ;;  %v891_v31 = vsel %vm887_vm7, %v871_v7, %v874_v27 }
  0x8b   : > { %v2620_v2 = vmin.u32 %v817_v5, %v3571_v19  ;;  %v897_v18 = vsel %vm889_vm8, %v880_v20, %v896_v33  ;;  %v893_v35 = vsel %vm889_vm8, %v877_v16, %v892_v29  ;;  %v899_v25 = vsel %vm887_vm7, %v877_v16, %v880_v20 }
  0x8c   : > { %v898_v26 = vsel %vm888_vm10, %v895_v15, %v897_v18  ;;  %v900_v42 = vsel %vm890_vm9, %v886_v11, 1326507024  ;;  %v741_v43 = vand.u32 3, %v740_v22  ;;  %v2627_v13 = vadd.s32 4294967169, %v963_v1 }
  0x8d   : > { %v819_v17 = vclz %v2620_v2  ;;  %v901_v41 = vsel %vm889_vm8, %v883_v8, %v900_v42  ;;  %v3584_v10 = vmul.u32.u64.low %v903_v23, %v898_v26  ;;  %v3585_v61 = vmul.u32.u64.high %v903_v23, %v898_v26, %v3584_v10 }
  0x8e   : > { %vm739_vm11 = vweird.f32 %v3247_v28  ;;  %v894_v14 = vsel %vm888_vm10, %v891_v31, %v893_v35  ;;  %v902_v60 = vsel %vm888_vm10, %v899_v25, %v901_v41  ;;  %vm753_vm12 = vcmp.lt.s32.totalorder %v3422_v59, 0 }
  0x8f   : > { %v2621_v58 = vadd.s32 4294967294, %v819_v17  ;;  %v3592_v45 = vmul.u32.u64.low %v903_v23, %v902_v60  ;;  %v3593_v44 = vmul.u32.u64.high %v903_v23, %v902_v60, %v3592_v45  ;;  %v969_v49 = vadd.s32 1, %v2627_v13 }
  0x90   : > { %vm746_vm13 = vcmp.eq.s32.totalorder %v741_v43, 2  ;;  %v807_v50 = vadd.s32 %v3513_v40, %v3527_v53  ;;  %v837_v0 = vsub.s32 4, %v3556_v24  ;;  %v910_v52 = vmul.u32 %v903_v23, %v894_v14  ;;  %v3639_v14 = vld [vmem:[%s3148_s18 + $0x38] sm:$0xff] }
  0x91   : > { %vm2622_vm14 = vcmp.lt.s32.totalorder %v2621_v58, 0  ;;  %v913_v55 = vadd.s32 1, %v3585_v61  ;;  %vm970_vm15 = vcmp.gt.s32.totalorder %v969_v49, 0  ;;  %vm3601_vm0 = vcmp.le.f32.partialorder %v751_v47, 0.7853982 }
  0x92   : > { %v822_v37 = vsel %vm2622_vm14, 0, %v2621_v58  ;;  %v971_v40 = vsel %vm970_vm15, %v969_v49, 0  ;;  %vm742_vm1 = vcmp.lt.s32.totalorder %v741_v43, 2  ;;  %vm743_vm2 = vcmp.eq.s32.totalorder %v741_v43, 0 }
  0x93   : > { %v3057_v48 = vpop.eup %3056  ;;  %v823_v56 = vsub.s32 32, %v822_v37  ;;  %v824_v57 = vshll.u32 %v3571_v19, %v822_v37  ;;  %v827_v4 = vsub.s32 4294967266, %v822_v37  ;;  %vm912_vm3 = vc.u32 %v3593_v44, %v3584_v10 }
  0x94   : > { %v3059_v53 = vpop.eup %3058  ;;  %v747_v51 = vxor.u32 2147483648, %v3057_v48  ;;  %v914_v47 = vsel %vm912_vm3, %v913_v55, %v3585_v61  ;;  %v959_v16 = vand.u32 2147483647, %v3542_v39  ;;  %v973_v8 = vand.u32 31, %v971_v40 }
  0x95   : > { %v744_v62 = vxor.u32 2147483648, %v3059_v53  ;;  %v825_v63 = vshrl.u32 %v807_v50, %v823_v56  ;;  %v828_v3 = vadd.s32 127, %v827_v4  ;;  %v915_v27 = vadd.s32 %v914_v47, %v910_v52 }
  0x96   : > { %v748_v7 = vsel %vm746_vm13, %v747_v51, %v3059_v53  ;;  %v838_v22 = vsel %vm753_vm12, %v837_v0, %v3556_v24  ;;  %v3615_v29 = vshrl.u32 %v971_v40, 5  ;;  %v974_v23 = vsub.s32 32, %v973_v8 }
  0x97   : > { %v745_v19 = vsel %vm743_vm2, %v3057_v48, %v744_v62  ;;  %v826_v20 = vor.u32 %v825_v63, %v824_v57  ;;  %v829_v21 = vshll.u32 %v828_v3, 23  ;;  %v916_v5 = vadd.s32 536870912, %v915_v27 }
  0x98   : > { %v749_v12 = vsel %vm742_vm1, %v745_v19, %v748_v7  ;;  %v976_v1 = vshll.u32 %v3102_v30, %v973_v8  ;;  %v977_v24 = vshrl.u32 %v3103_v32, %v974_v23  ;;  %v979_v31 = vshll.u32 %v3103_v32, %v973_v8 }
  0x99   : > { %v750_v11 = vsel %vm739_vm11, nan, %v749_v12  ;;  %v830_v15 = vor.u32 4788187, %v829_v21  ;;  %v833_v33 = vcvt.s32.f32 %v826_v20  ;;  %v3621_v2 = vshrl.u32 %v916_v5, 30 }
  0x9a   : > { %1286 = vrot.lane.b32.xlu1 %v750_v11, %s3108_s19  ;;  %v980_v18 = vshrl.u32 %v3104_v34, %v974_v23  ;;  %v982_v26 = vshll.u32 %v3104_v34, %v973_v8  ;;  %v983_v28 = vshrl.u32 %v3105_v36, %v974_v23  ;;  %v985_v25 = vshll.u32 %v3105_v36, %v973_v8 }
  0x9b   : > { %v831_v35 = vand.u32 2147483647, %v830_v15  ;;  %v840_v42 = vsel %vm3601_vm0, 0, %v838_v22  ;;  %v918_v43 = vshll.u32 %v3621_v2, 30  ;;  %v966_v17 = vand.u32 8388607, %v959_v16 }
  0x9c   : > { %vm991_vm4 = vcmp.lt.s32.totalorder %v3615_v29, 1  ;;  %v975_v61 = vshrl.u32 %v3102_v30, %v974_v23  ;;  %v986_v13 = vshrl.u32 %v3106_v38, %v974_v23  ;;  %v988_v58 = vshll.u32 %v3106_v38, %v973_v8 }
  0x9d   : > { %v834_v41 = vmul.f32 %v833_v33, %v831_v35  ;;  %v3641_v60 = vsub.s32 %v915_v27, %v918_v43  ;;  %v978_v45 = vor.u32 %v977_v24, %v976_v1  ;;  %v981_v49 = vor.u32 %v980_v18, %v979_v31 }
  0x9e   : > { %v989_v50 = vshrl.u32 %v3107_v46, %v974_v23  ;;  %v984_v37 = vor.u32 %v983_v28, %v982_v26  ;;  %v987_v52 = vor.u32 %v986_v13, %v985_v25  ;;  %vm994_vm5 = vcmp.lt.s32.totalorder %v3615_v29, 4  ;;  %v186_v26 = vld [vmem:[%s4396_s1 + $0x68] sm:$0xff] }
  0x9f   : > { %v835_v0 = vxor.u32 2147483648, %v834_v41  ;;  %vm857_vm6 = vcmp.lt.s32.totalorder %v3472_v6, 0  ;;  %v921_v55 = vsub.s32 0, %v3641_v60  ;;  %v967_v48 = vor.u32 8388608, %v966_v17 }
  0xa0   : > { %vm993_vm7 = vcmp.lt.s32.totalorder %v3615_v29, 3  ;;  %v1066_v56 = vand.u32 2139095040, %v3639_v14  ;;  %v990_v4 = vor.u32 %v989_v50, %v988_v58  ;;  %v996_v40 = vsel %vm994_vm5, %v984_v37, 2102212464 }
  0xa1   : > { %v836_v57 = vsel %vm753_vm12, %v835_v0, %v834_v41  ;;  %v1000_v53 = vsel %vm994_vm5, %v987_v52, 920167782  ;;  %v2624_v62 = vmin.u32 %v921_v55, %v3641_v60  ;;  %vm992_vm8 = vcmp.lt.s32.totalorder %v3615_v29, 2  ;;  %v3707_v41 = vld [vmem:[%s4396_s1 + $0x60] sm:$0xff] }
  0xa2   : > { %v839_v51 = vsel %vm3601_vm0, %v3422_v59, %v836_v57  ;;  %v999_v63 = vsel %vm991_vm4, %v978_v45, %v981_v49  ;;  %v995_v3 = vsel %vm991_vm4, %v975_v61, %v978_v45  ;;  %v997_v47 = vsel %vm993_vm7, %v981_v49, %v996_v40  ;;  %v3711_v61 = vld [vmem:[%s3148_s18 + $0x40] sm:$0xff]  ;;  %v184_v57 = vld [vmem:[%s4396_s1 + $0x58] sm:$0xff] }
  0xa3   : > { %3060 = vcosq.f32 %v839_v51  ;;  %v1001_v7 = vsel %vm993_vm7, %v984_v37, %v1000_v53  ;;  %v844_v54 = vadd.s32 3, %v840_v42  ;;  %vm3670_vm9 = vcmp.le.f32.partialorder %v855_v9, 0.7853982 }
  0xa4   : > { %3062 = vsinq.f32 %v839_v51  ;;  %v923_v8 = vclz %v2624_v62  ;;  %v1003_v19 = vsel %vm991_vm4, %v981_v49, %v984_v37  ;;  %v941_v20 = vsub.s32 4, %v3621_v2 }
  0xa5   : > { %v1002_v21 = vsel %vm992_vm8, %v999_v63, %v1001_v7  ;;  %v1004_v22 = vsel %vm994_vm5, %v990_v4, 1326507024  ;;  %v1007_v12 = vshll.u32 %v967_v48, 8  ;;  %v998_v9 = vsel %vm992_vm8, %v995_v3, %v997_v47 }
  0xa6   : > { %v2625_v5 = vadd.s32 4294967294, %v923_v8  ;;  %v1005_v23 = vsel %vm993_vm7, %v987_v52, %v1004_v22  ;;  %v1067_v11 = vshrl.u32 %v1066_v56, 23  ;;  %v911_v15 = vadd.s32 %v3584_v10, %v3593_v44  ;;  %v3084_v56 = vld [vmem:[%s3148_s18] sm:$0xff] }
  0xa7   : > { %v1006_v33 = vsel %vm992_vm8, %v1003_v19, %v1005_v23  ;;  %v3689_v1 = vmul.u32.u64.low %v1007_v12, %v1002_v21  ;;  %v3690_v24 = vmul.u32.u64.high %v1007_v12, %v1002_v21, %v3689_v1  ;;  %v942_v10 = vsel %vm857_vm6, %v941_v20, %v3621_v2  ;;  %v3085_v21 = vld [vmem:[%s3148_s18 + $0x8] sm:$0xff] }
  0xa8   : > { %vm2626_vm10 = vcmp.lt.s32.totalorder %v2625_v5, 0  ;;  %v3693_v31 = vmul.u32.u64.low %v1007_v12, %v1006_v33  ;;  %v3694_v18 = vmul.u32.u64.high %v1007_v12, %v1006_v33, %v3693_v31  ;;  %v2631_v35 = vadd.s32 4294967169, %v1067_v11  ;;  %v183_v11 = vld [vmem:[%s4396_s1 + $0x50] sm:$0xff] }
  0xa9   : > { %v926_v28 = vsel %vm2626_vm10, 0, %v2625_v5  ;;  %v1014_v44 = vmul.u32 %v1007_v12, %v998_v9  ;;  %v3109_v17 = vmov 0.0   ;;  %v3713_v13 = vand.u32 3, %v844_v54 }
  0xaa   : > { %v927_v29 = vsub.s32 32, %v926_v28  ;;  %v928_v25 = vshll.u32 %v3641_v60, %v926_v28  ;;  %v931_v42 = vsub.s32 4294967266, %v926_v28  ;;  %v1073_v43 = vadd.s32 1, %v2631_v35  ;;  %2776 = vmatprep.subr.mxu0 %v3109_v17  ;;  %2983 = vmatprep.subr.mxu1 %v3109_v17 }
  0xab   : > { %v1017_v2 = vadd.s32 1, %v3690_v24  ;;  %2777 = vmatpush3.msra.mxu0 %v186_v26  ;;  %vm197_vm11 = vcmask 130048   ;;  %2985 = vmatpush3.msra.mxu1 %v186_v26  ;;  %vm1016_vm12 = vc.u32 %v3694_v18, %v3689_v1  ;;  %v1063_v45 = vand.u32 2147483647, %v3639_v14 }
  0xac   : > { %v929_v58 = vshrl.u32 %v911_v15, %v927_v29  ;;  %v932_v60 = vadd.s32 127, %v931_v42  ;;  %2778 = vmatprep.subr.mxu0 %v3109_v17  ;;  %vm3110_vm13 = vmmov 0   ;;  %v944_v49 = vsel %vm3670_vm9, 0, %v942_v10  ;;  %2984 = vmatprep.subr.mxu1 %v3109_v17 }
  0xad   : > { %2780 = vmatprep.mubr.msk.f32.mxu0 %vm3110_vm13, %v3109_v17  ;;  %v1018_v50 = vsel %vm1016_vm12, %v1017_v2, %v3690_v24  ;;  %vm1074_vm14 = vcmp.gt.s32.totalorder %v1073_v43, 0  ;;  %2779 = vmatpush3.msra.mxu0 %v3707_v41  ;;  %v1170_v0 = vand.u32 2139095040, %v3711_v61  ;;  %vm843_vm15 = vweird.f32 %v3422_v59 }
  0xae   : > { %v930_v37 = vor.u32 %v929_v58, %v928_v25  ;;  %v933_v52 = vshll.u32 %v932_v60, 23  ;;  %v1019_v55 = vadd.s32 %v1018_v50, %v1014_v44  ;;  %v1075_v48 = vsel %vm1074_vm14, %v1073_v43, 0  ;;  %2781 = vmatmul.mubr.msk.f32.vlgmr.msra.gmra.mxu0 %vm197_vm11, %v3084_v56  ;;  %2986 = vmatpush3.msra.mxu1 %v3707_v41  ;;  %v3086_v43 = vld [vmem:[%s3148_s18 + $0x10] sm:$0xff] }
  0xaf   : > { %vm846_vm0 = vcmp.lt.s32.totalorder %v3713_v13, 2  ;;  %vm847_vm1 = vcmp.eq.s32.totalorder %v3713_v13, 0  ;;  %v1077_v4 = vand.u32 31, %v1075_v48  ;;  %2783 = vmatprep.mubr.msk.f32.mxu0 %vm3110_vm13, %v3109_v17  ;;  %2795 = vmatprep.mubr.msk.f32.mxu1 %vm3110_vm13, %v3109_v17  ;;  %vm850_vm2 = vcmp.eq.s32.totalorder %v3713_v13, 2  ;;  %v3792_v13 = vld [vmem:[%s4396_s1 + $0x48] sm:$0xff] }
  0xb0   : > { %v3061_v40 = vpop.eup %3060  ;;  %v934_v53 = vor.u32 4788187, %v933_v52  ;;  %v937_v51 = vcvt.s32.f32 %v930_v37  ;;  %v1020_v62 = vadd.s32 536870912, %v1019_v55  ;;  %2796 = vmatmul.mubr.msk.f32.vlgmr.msra.gmra.mxu1 %vm197_vm11, %v3472_v6  ;;  %2807 = vmatprep.subr.mxu1 %v3109_v17  ;;  %v3745_v47 = vadd.s32 3, %v944_v49 }
  0xb1   : > { %v3063_v63 = vpop.eup %3062  ;;  %v851_v3 = vxor.u32 2147483648, %v3061_v40  ;;  %v3749_v7 = vand.u32 8388607, %v1063_v45  ;;  %v1078_v54 = vsub.s32 32, %v1077_v4  ;;  %2798 = vmatprep.mubr.msk.f32.mxu1 %vm3110_vm13, %v3109_v17  ;;  %2808 = vmatpush3.msra.mxu1 %v184_v57  ;;  %v1171_v22 = vshrl.u32 %v1170_v0, 23 }
  0xb2   : > { %v848_v8 = vxor.u32 2147483648, %v3063_v63  ;;  %v935_v19 = vand.u32 2147483647, %v934_v53  ;;  %v3753_v20 = vshrl.u32 %v1020_v62, 30  ;;  %2784 = vmatmul.mubr.msk.f32.gmra.mxu0 %vm197_vm11, %v3085_v21  ;;  %2809 = vmatprep.subr.mxu1 %v3109_v17  ;;  %v1080_v5 = vshll.u32 %v3102_v30, %v1077_v4 }
  0xb3   : > { %v852_v12 = vsel %vm850_vm2, %v851_v3, %v3063_v63  ;;  %v1081_v9 = vshrl.u32 %v3103_v32, %v1078_v54  ;;  %v1083_v23 = vshll.u32 %v3103_v32, %v1077_v4  ;;  %2786 = vmatprep.mubr.msk.f32.mxu0 %vm3110_vm13, %v3109_v17  ;;  %v1084_v31 = vshrl.u32 %v3104_v34, %v1078_v54 }
  0xb4   : > { %v849_v15 = vsel %vm847_vm1, %v3061_v40, %v848_v8  ;;  %v938_v33 = vmul.f32 %v937_v51, %v935_v19  ;;  %v1022_v24 = vshll.u32 %v3753_v20, 30  ;;  %2799 = vmatmul.mubr.msk.f32.gmra.mxu1 %vm197_vm11, %v3542_v39  ;;  %v3776_v26 = vshrl.u32 %v1075_v48, 5  ;;  %v3087_v51 = vld [vmem:[%s3148_s18 + $0x18] sm:$0xff] }
  0xb5   : > { %v853_v35 = vsel %vm846_vm0, %v849_v15, %v852_v12  ;;  %v1079_v28 = vshrl.u32 %v3102_v30, %v1078_v54  ;;  %v1086_v10 = vshll.u32 %v3104_v34, %v1077_v4  ;;  %2801 = vmatprep.mubr.msk.f32.mxu1 %vm3110_vm13, %v3109_v17  ;;  %v1087_v42 = vshrl.u32 %v3105_v36, %v1078_v54 }
  0xb6   : > { %v854_v44 = vsel %vm843_vm15, nan, %v853_v35  ;;  %v939_v29 = vxor.u32 2147483648, %v938_v33  ;;  %v3784_v25 = vsub.s32 %v1019_v55, %v1022_v24  ;;  %2787 = vmatmul.mubr.msk.f32.gmra.mxu0 %vm197_vm11, %v3086_v43  ;;  %2810 = vmatpush3.msra.mxu1 %v183_v11  ;;  %v1071_v2 = vor.u32 8388608, %v3749_v7  ;;  %v3810_v55 = vld [vmem:[%s4396_s1 + $0x40] sm:$0xff] }
  0xb7   : > { %1288 = vrot.lane.b32.xlu0 %v854_v44, %s3108_s19  ;;  %v1082_v58 = vor.u32 %v1081_v9, %v1080_v5  ;;  %v1089_v60 = vshll.u32 %v3105_v36, %v1077_v4  ;;  %v1090_v49 = vshrl.u32 %v3106_v38, %v1078_v54  ;;  %2789 = vmatprep.mubr.msk.f32.mxu0 %vm3110_vm13, %v3109_v17  ;;  %vm1095_vm3 = vcmp.lt.s32.totalorder %v3776_v26, 1 }
  0xb8   : > { %v940_v50 = vsel %vm857_vm6, %v939_v29, %v938_v33  ;;  %v1025_v0 = vsub.s32 0, %v3784_v25  ;;  %v1085_v37 = vor.u32 %v1084_v31, %v1083_v23  ;;  %v1092_v52 = vshll.u32 %v3106_v38, %v1077_v4  ;;  %2802 = vmatmul.mubr.msk.f32.gmra.mxu1 %vm197_vm11, %v3639_v14  ;;  %2811 = vmatprep.subr.mxu1 %v3109_v17 }
  0xb9   : > { %v943_v48 = vsel %vm3670_vm9, %v3472_v6, %v940_v50  ;;  %v1091_v56 = vor.u32 %v1090_v49, %v1089_v60  ;;  %v1093_v57 = vshrl.u32 %v3107_v46, %v1078_v54  ;;  %2804 = vmatprep.mubr.msk.f32.mxu1 %vm3110_vm13, %v3109_v17  ;;  %2812 = vmatpush3.msra.mxu1 %v3792_v13  ;;  %v2635_v4 = vadd.s32 4294967169, %v1171_v22 }
  0xba   : > { %3064 = vcosq.f32 %v943_v48  ;;  %v2628_v40 = vmin.u32 %v1025_v0, %v3784_v25  ;;  %v1088_v53 = vor.u32 %v1087_v42, %v1086_v10  ;;  %2790 = vmatmul.mubr.msk.f32.gmra.mxu0 %vm197_vm11, %v3087_v51  ;;  %2813 = vmatprep.subr.mxu1 %v3109_v17  ;;  %vm1097_vm4 = vcmp.lt.s32.totalorder %v3776_v26, 3 }
  0xbb   : > { %3066 = vsinq.f32 %v943_v48  ;;  %v1094_v27 = vor.u32 %v1093_v57, %v1092_v52  ;;  %vm1098_vm5 = vcmp.lt.s32.totalorder %v3776_v26, 4  ;;  %2792 = vmatprep.mubr.msk.f32.mxu0 %vm3110_vm13, %v3109_v17  ;;  %2814 = vmatpush3.msra.mxu1 %v3810_v55  ;;  %v3830_v62 = vand.u32 3, %v3745_v47 }
  0xbc   : > { %v1027_v63 = vclz %v2628_v40  ;;  %vm1096_vm6 = vcmp.lt.s32.totalorder %v3776_v26, 2  ;;  %v1111_v3 = vshll.u32 %v1071_v2, 8  ;;  %2805 = vmatmul.mubr.msk.f32.gmra.mxu1 %vm197_vm11, %v3711_v61  ;;  %v1099_v7 = vsel %vm1095_vm3, %v1079_v28, %v1082_v58 }
  0xbd   : > { %v1100_v54 = vsel %vm1098_vm5, %v1088_v53, 2102212464  ;;  %v1103_v8 = vsel %vm1095_vm3, %v1082_v58, %v1085_v37  ;;  %v1104_v47 = vsel %vm1098_vm5, %v1091_v56, 920167782  ;;  %2815 = vmatprep.mubr.msk.f32.mxu1 %vm3110_vm13, %v3109_v17  ;;  %v1107_v12 = vsel %vm1095_vm3, %v1085_v37, %v1088_v53 }
  0xbe   : > { %v2629_v19 = vadd.s32 4294967294, %v1027_v63  ;;  %v1101_v21 = vsel %vm1097_vm4, %v1085_v37, %v1100_v54  ;;  %v1105_v22 = vsel %vm1097_vm4, %v1088_v53, %v1104_v47  ;;  %2793 = vmatmul.mubr.msk.f32.gmra.mxu0 %vm197_vm11, %v3422_v59  ;;  %v1015_v5 = vadd.s32 %v3689_v1, %v3694_v18 }
  0xbf   : > { %v1106_v9 = vsel %vm1096_vm6, %v1103_v8, %v1105_v22  ;;  %v1108_v23 = vsel %vm1098_vm5, %v1094_v27, 1326507024  ;;  %v1177_v11 = vadd.s32 1, %v2635_v4  ;;  %vm950_vm8 = vcmp.lt.s32.totalorder %v3830_v62, 2 }
  0xc0   : > { %vm2630_vm7 = vcmp.lt.s32.totalorder %v2629_v19, 0  ;;  %v1109_v15 = vsel %vm1097_vm4, %v1091_v56, %v1108_v23  ;;  %v3861_v33 = vmul.u32.u64.low %v1111_v3, %v1106_v9  ;;  %v3862_v24 = vmul.u32.u64.high %v1111_v3, %v1106_v9, %v3861_v33 }
  0xc1   : > { %v1030_v59 = vsel %vm2630_vm7, 0, %v2629_v19  ;;  %v1102_v1 = vsel %vm1096_vm6, %v1099_v7, %v1101_v21  ;;  %v1110_v18 = vsel %vm1096_vm6, %v1107_v12, %v1109_v15  ;;  %vm1178_vm9 = vcmp.gt.s32.totalorder %v1177_v11, 0 }
  0xc2   : > { %vm947_vm10 = vweird.f32 %v3472_v6  ;;  %v1031_v31 = vsub.s32 32, %v1030_v59  ;;  %v1032_v35 = vshll.u32 %v3784_v25, %v1030_v59  ;;  %v1035_v28 = vsub.s32 4294967266, %v1030_v59 }
  0xc3   : > { %v1179_v10 = vsel %vm1178_vm9, %v1177_v11, 0  ;;  %vm951_vm11 = vcmp.eq.s32.totalorder %v3830_v62, 0  ;;  %v3873_v44 = vmul.u32.u64.low %v1111_v3, %v1110_v18  ;;  %v3874_v29 = vmul.u32.u64.high %v1111_v3, %v1110_v18, %v3873_v44 }
  0xc4   : > { %v1181_v42 = vand.u32 31, %v1179_v10  ;;  %vm954_vm12 = vcmp.eq.s32.totalorder %v3830_v62, 2  ;;  %v1033_v43 = vshrl.u32 %v1015_v5, %v1031_v31  ;;  %v1036_v2 = vadd.s32 127, %v1035_v28 }
  0xc5   : > { %v1121_v26 = vadd.s32 1, %v3862_v24  ;;  %vm961_vm14 = vcmp.lt.s32.totalorder %v3542_v39, 0  ;;  %v1045_v58 = vsub.s32 4, %v3753_v20  ;;  %v1118_v60 = vmul.u32 %v1111_v3, %v1102_v1 }
  0xc6   : > { %v1182_v25 = vsub.s32 32, %v1181_v42  ;;  %v1167_v49 = vand.u32 2147483647, %v3711_v61  ;;  %vm3883_vm15 = vcmp.le.f32.partialorder %v959_v16, 0.7853982  ;;  %v1034_v0 = vor.u32 %v1033_v43, %v1032_v35 }
  0xc7   : > { %v1037_v37 = vshll.u32 %v1036_v2, 23  ;;  %v3887_v52 = vshrl.u32 %v1179_v10, 5  ;;  %v1184_v48 = vshll.u32 %v3102_v30, %v1181_v42  ;;  %v3065_v56 = vpop.eup %3064  ;;  %vm1120_vm0 = vc.u32 %v3874_v29, %v3861_v33 }
  0xc8   : > { %v1185_v57 = vshrl.u32 %v3103_v32, %v1182_v25  ;;  %v1187_v4 = vshll.u32 %v3103_v32, %v1181_v42  ;;  %v1188_v40 = vshrl.u32 %v3104_v34, %v1182_v25  ;;  %v3067_v16 = vpop.eup %3066  ;;  %v955_v53 = vxor.u32 2147483648, %v3065_v56 }
  0xc9   : > { %v1038_v51 = vor.u32 4788187, %v1037_v37  ;;  %v1041_v27 = vcvt.s32.f32 %v1034_v0  ;;  %v1122_v63 = vsel %vm1120_vm0, %v1121_v26, %v3862_v24  ;;  %v952_v3 = vxor.u32 2147483648, %v3067_v16 }
  0xca   : > { %v1123_v7 = vadd.s32 %v1122_v63, %v1118_v60  ;;  %v1174_v54 = vand.u32 8388607, %v1167_v49  ;;  %v1190_v8 = vshll.u32 %v3104_v34, %v1181_v42  ;;  %v956_v47 = vsel %vm954_vm12, %v955_v53, %v3067_v16 }
  0xcb   : > { %v1039_v19 = vand.u32 2147483647, %v1038_v51  ;;  %v1191_v32 = vshrl.u32 %v3105_v36, %v1182_v25  ;;  %v1193_v21 = vshll.u32 %v3105_v36, %v1181_v42  ;;  %v953_v22 = vsel %vm951_vm11, %v3065_v56, %v952_v3 }
  0xcc   : > { %v1124_v12 = vadd.s32 536870912, %v1123_v7  ;;  %vm1298_vm1 = vcmask 261120   ;;  %v1186_v5 = vor.u32 %v1185_v57, %v1184_v48  ;;  %v1194_v9 = vshrl.u32 %v3106_v38, %v1182_v25 }
  0xcd   : > { %v957_v23 = vsel %vm950_vm8, %v953_v22, %v956_v47  ;;  %v1042_v34 = vmul.f32 %v1041_v27, %v1039_v19  ;;  %v1189_v11 = vor.u32 %v1188_v40, %v1187_v4  ;;  %v1196_v15 = vshll.u32 %v3106_v38, %v1181_v42 }
  0xce   : > { %v958_v24 = vsel %vm947_vm10, nan, %v957_v23  ;;  %v3911_v59 = vshrl.u32 %v1124_v12, 30  ;;  %v1183_v36 = vshrl.u32 %v3102_v30, %v1182_v25  ;;  %v1197_v1 = vshrl.u32 %v3107_v46, %v1182_v25 }
  0xcf   : > { %1290 = vrot.lane.b32.xlu1 %v958_v24, %s3108_s19  ;;  %v1043_v18 = vxor.u32 2147483648, %v1042_v34  ;;  %v1192_v31 = vor.u32 %v1191_v32, %v1190_v8  ;;  %v1195_v35 = vor.u32 %v1194_v9, %v1193_v21  ;;  %vm1199_vm2 = vcmp.lt.s32.totalorder %v3887_v52, 1 }
  0xd0   : > { %v1046_v38 = vsel %vm961_vm14, %v1045_v58, %v3753_v20  ;;  %v1126_v6 = vshll.u32 %v3911_v59, 30  ;;  %v1175_v62 = vor.u32 8388608, %v1174_v54  ;;  %vm1202_vm3 = vcmp.lt.s32.totalorder %v3887_v52, 4 }
  0xd1   : > { %v1044_v30 = vsel %vm961_vm14, %v1043_v18, %v1042_v34  ;;  %v1198_v46 = vor.u32 %v1197_v1, %v1196_v15  ;;  %vm1201_vm4 = vcmp.lt.s32.totalorder %v3887_v52, 3  ;;  %v1204_v28 = vsel %vm1202_vm3, %v1192_v31, 2102212464 }
  0xd2   : > { %v1047_v10 = vsel %vm3883_vm15, %v3542_v39, %v1044_v30  ;;  %v1127_v44 = vsub.s32 %v1123_v7, %v1126_v6  ;;  %vm1200_vm5 = vcmp.lt.s32.totalorder %v3887_v52, 2  ;;  %v1207_v20 = vsel %vm1199_vm2, %v1186_v5, %v1189_v11 }
  0xd3   : > { %v1048_v42 = vsel %vm3883_vm15, 0, %v1046_v38  ;;  %3068 = vcosq.f32 %v1047_v10  ;;  %v1203_v43 = vsel %vm1199_vm2, %v1183_v36, %v1186_v5  ;;  %v1208_v2 = vsel %vm1202_vm3, %v1195_v35, 920167782 }
  0xd4   : > { %3070 = vsinq.f32 %v1047_v10  ;;  %v1129_v26 = vsub.s32 0, %v1127_v44  ;;  %v1205_v58 = vsel %vm1201_vm4, %v1189_v11, %v1204_v28  ;;  %v1209_v60 = vsel %vm1201_vm4, %v1192_v31, %v1208_v2 }
  0xd5   : > { %v1210_v25 = vsel %vm1200_vm5, %v1207_v20, %v1209_v60  ;;  %v1211_v50 = vsel %vm1199_vm2, %v1189_v11, %v1192_v31  ;;  %v1212_v0 = vsel %vm1202_vm3, %v1198_v46, 1326507024  ;;  %v1215_v37 = vshll.u32 %v1175_v62, 8 }
  0xd6   : > { %v2632_v48 = vmin.u32 %v1129_v26, %v1127_v44  ;;  %v1281_v56 = vpop.permute.xlu0 %1280  ;;  %v1213_v57 = vsel %vm1201_vm4, %v1195_v35, %v1212_v0  ;;  %v1052_v53 = vadd.s32 3, %v1048_v42  ;;  %v1206_v27 = vsel %vm1200_vm5, %v1203_v43, %v1205_v58 }
  0xd7   : > { %2816 = vmatmul.mubr.msk.f32.vlgmr.msra.gmra.mxu1 %vm1298_vm1, %v1281_v56  ;;  %v1214_v4 = vsel %vm1200_vm5, %v1211_v50, %v1213_v57  ;;  %v3954_v40 = vmul.u32.u64.low %v1215_v37, %v1210_v25  ;;  %v3955_v16 = vmul.u32.u64.high %v1215_v37, %v1210_v25, %v3954_v40  ;;  %v1222_v54 = vmul.u32 %v1215_v37, %v1206_v27 }
  0xd8   : > { %v1131_v51 = vclz %v2632_v48  ;;  %2818 = vmatprep.mubr.msk.f32.mxu1 %vm3110_vm13, %v3109_v17  ;;  %v3962_v63 = vmul.u32.u64.low %v1215_v37, %v1214_v4  ;;  %v3963_v3 = vmul.u32.u64.high %v1215_v37, %v1214_v4, %v3962_v63  ;;  %v1053_v47 = vand.u32 3, %v1052_v53 }
  0xd9   : > { %v1225_v8 = vadd.s32 1, %v3955_v16  ;;  %v1119_v19 = vadd.s32 %v3861_v33, %v3874_v29  ;;  %vm1051_vm11 = vweird.f32 %v3542_v39  ;;  %vm1065_vm12 = vcmp.lt.s32.totalorder %v3639_v14, 0 }
  0xda   : > { %v2633_v7 = vadd.s32 4294967294, %v1131_v51  ;;  %vm1224_vm7 = vc.u32 %v3963_v3, %v3954_v40  ;;  %vm1058_vm8 = vcmp.eq.s32.totalorder %v1053_v47, 2  ;;  %vm1055_vm9 = vcmp.eq.s32.totalorder %v1053_v47, 0 }
  0xdb   : > { %v1226_v12 = vsel %vm1224_vm7, %v1225_v8, %v3955_v16  ;;  %vm1054_vm10 = vcmp.lt.s32.totalorder %v1053_v47, 2  ;;  %v1149_v20 = vsub.s32 4, %v3911_v59  ;;  %vm1064_vm14 = vcmp.le.f32.partialorder %v1063_v45, 0.7853982 }
  0xdc   : > { %vm2634_vm6 = vcmp.lt.s32.totalorder %v2633_v7, 0  ;;  %v1227_v9 = vadd.s32 %v1226_v12, %v1222_v54  ;;  %v1223_v0 = vadd.s32 %v3954_v40, %v3963_v3  ;;  %v1427_v51 = vlaneseq  ;;  %v3996_v40 = vld [vmem:[%s4396_s1 + $0x10] sm:$0xff] }
  0xdd   : > { %v1134_v32 = vsel %vm2634_vm6, 0, %v2633_v7  ;;  %v1150_v26 = vsel %vm1065_vm12, %v1149_v20, %v3911_v59  ;;  %v3990_v59 = vld [vmem:[%s4396_s1 + $0x18] sm:$0xff]  ;;  %vm1155_vm4 = vweird.f32 %v3639_v14  ;;  %vm1169_vm5 = vcmp.lt.s32.totalorder %v3711_v61, 0 }
  0xde   : > { %v1135_v21 = vsub.s32 32, %v1134_v32  ;;  %v1136_v22 = vshll.u32 %v1127_v44, %v1134_v32  ;;  %v1139_v52 = vsub.s32 4294967266, %v1134_v32  ;;  %v1283_v5 = vpop.permute.xlu0 %1282  ;;  %v1228_v29 = vadd.s32 536870912, %v1227_v9  ;;  %2862 = vmatprep.subr.mxu1 %v3990_v59  ;;  %v4040_v20 = vld [vmem:[%s4396_s1 + $0x38] sm:$0xff] }
  0xdf   : > { %2819 = vmatmul.mubr.msk.f32.gmra.mxu1 %vm1298_vm1, %v1283_v5  ;;  %v1152_v50 = vsel %vm1064_vm14, 0, %v1150_v26  ;;  %v4001_v7 = vshrl.u32 %v1427_v51, 7  ;;  %vm1168_vm6 = vcmp.le.f32.partialorder %v1167_v49, 0.7853982  ;;  %v4025_v49 = vld [vmem:[%s4396_s1] sm:$0xff]  ;;  %2842 = vmatprep.subr.mxu0 %v4040_v20 }
  0xe0   : > { %v3069_v23 = vpop.eup %3068  ;;  %v1137_v34 = vshrl.u32 %v1119_v19, %v1135_v21  ;;  %v1140_v11 = vadd.s32 127, %v1139_v52  ;;  %2821 = vmatprep.mubr.msk.f32.mxu1 %vm3110_vm13, %v3109_v17  ;;  %v3975_v31 = vshrl.u32 %v1228_v29, 30  ;;  %v1156_v48 = vadd.s32 3, %v1152_v50  ;;  %2863 = vmatpush3.msra.mxu1 %v3990_v59 }
  0xe1   : > { %v3071_v15 = vpop.eup %3070  ;;  %v1059_v33 = vxor.u32 2147483648, %v3069_v23  ;;  %2864 = vmatprep.subr.mxu1 %v3996_v40  ;;  %v1429_v47 = vsub.s32 0, %v4001_v7  ;;  %2843 = vmatpush3.msra.mxu0 %v4040_v20 }
  0xe2   : > { %v1056_v24 = vxor.u32 2147483648, %v3071_v15  ;;  %v1138_v36 = vor.u32 %v1137_v34, %v1136_v22  ;;  %v1141_v1 = vshll.u32 %v1140_v11, 23  ;;  %v1230_v30 = vshll.u32 %v3975_v31, 30  ;;  %2865 = vmatpush3.msra.mxu1 %v3996_v40 }
  0xe3   : > { %v1060_v18 = vsel %vm1058_vm8, %v1059_v33, %v3071_v15  ;;  %v1157_v27 = vand.u32 3, %v1156_v48  ;;  %v1430_v52 = vrot.slane %v3707_v41, %v1429_v47 }
  0xe4   : > { %v1057_v35 = vsel %vm1055_vm9, %v3069_v23, %v1056_v24  ;;  %v1142_v38 = vor.u32 4788187, %v1141_v1  ;;  %v1145_v6 = vcvt.s32.f32 %v1138_v36  ;;  %v1231_v10 = vsub.s32 %v1227_v9, %v1230_v30 }
  0xe5   : > { %v1061_v62 = vsel %vm1054_vm10, %v1057_v35, %v1060_v18  ;;  %vm1162_vm0 = vcmp.eq.s32.totalorder %v1157_v27, 2  ;;  %vm1159_vm2 = vcmp.eq.s32.totalorder %v1157_v27, 0  ;;  %vm1158_vm3 = vcmp.lt.s32.totalorder %v1157_v27, 2  ;;  %v4020_v18 = vld [vmem:[%s4396_s1 + $0x8] sm:$0xff] }
  0xe6   : > { %v1062_v46 = vsel %vm1051_vm11, nan, %v1061_v62  ;;  %v1143_v28 = vand.u32 2147483647, %v1142_v38  ;;  %v1233_v39 = vsub.s32 0, %v1231_v10  ;;  %v1253_v23 = vsub.s32 4, %v3975_v31  ;;  %2866 = vmatprep.subr.mxu1 %v4020_v18 }
  0xe7   : > { %1292 = vrot.lane.b32.xlu0 %v1062_v46, %s3108_s19  ;;  %2867 = vmatpush3.msra.mxu1 %v4020_v18  ;;  %vm1259_vm10 = vweird.f32 %v3711_v61  ;;  %vm1726_vm11 = vcmask 523264  }
  0xe8   : > { %v1146_v44 = vmul.f32 %v1145_v6, %v1143_v28  ;;  %v2636_v43 = vmin.u32 %v1233_v39, %v1231_v10  ;;  %2868 = vmatprep.subr.mxu1 %v4025_v49  ;;  %v4045_v39 = vld [vmem:[%s4396_s1 + $0x30] sm:$0xff] }
  0xe9   : > { %2869 = vmatpush3.msra.mxu1 %v4025_v49  ;;  %2844 = vmatprep.subr.mxu0 %v4045_v39 }
  0xea   : > { %v1147_v42 = vxor.u32 2147483648, %v1146_v44  ;;  %v1235_v60 = vclz %v2636_v43  ;;  %2901 = vmatprep.subr.mxu1 %v3109_v17  ;;  %2845 = vmatpush3.msra.mxu0 %v4045_v39 }
  0xeb   : > { %1432 = vrot.lane.b32.xlu0 %v1430_v52, %s3111_s9 }
  0xec   : > { %v1148_v2 = vsel %vm1065_vm12, %v1147_v42, %v1146_v44  ;;  %v2637_v25 = vadd.s32 4294967294, %v1235_v60  ;;  %v4059_v42 = vld [vmem:[%s4396_s1 + $0x20] sm:$0xff]  ;;  %vm2515_vm12 = vcmask 523520  }
  0xed   : > { %v1151_v58 = vsel %vm1064_vm14, %v3639_v14, %v1148_v2  ;;  %v1254_v14 = vsel %vm1169_vm5, %v1253_v23, %v3975_v31 }
  0xee   : > { %3072 = vcosq.f32 %v1151_v58  ;;  %vm2638_vm15 = vcmp.lt.s32.totalorder %v2637_v25, 0  ;;  %v1256_v36 = vsel %vm1168_vm6, 0, %v1254_v14 }
  0xef   : > { %3074 = vsinq.f32 %v1151_v58  ;;  %v1238_v37 = vsel %vm2638_vm15, 0, %v2637_v25  ;;  %v1260_v1 = vadd.s32 3, %v1256_v36  ;;  %1720 = vrot.lane.b32.xlu0 %v3707_v41, %s3112_s25 }
  0xf0   : > { %v1239_v56 = vsub.s32 32, %v1238_v37  ;;  %v1240_v45 = vshll.u32 %v1231_v10, %v1238_v37  ;;  %v1243_v57 = vsub.s32 4294967266, %v1238_v37 }
  0xf1   : > { %v1261_v35 = vand.u32 3, %v1260_v1 }
  0xf2   : > { %v1241_v4 = vshrl.u32 %v1223_v0, %v1239_v56  ;;  %v1244_v16 = vadd.s32 127, %v1243_v57 }
  0xf3   : > { %vm1266_vm7 = vcmp.eq.s32.totalorder %v1261_v35, 2  ;;  %vm1263_vm8 = vcmp.eq.s32.totalorder %v1261_v35, 0  ;;  %vm1262_vm9 = vcmp.lt.s32.totalorder %v1261_v35, 2 }
  0xf4   : > { %v1242_v63 = vor.u32 %v1241_v4, %v1240_v45  ;;  %v1245_v3 = vshll.u32 %v1244_v16, 23 }
  0xf5   : > { %v1285_v53 = vpop.permute.xlu1 %1284 }
  0xf6   : > { %2822 = vmatmul.mubr.msk.f32.gmra.mxu1 %vm1298_vm1, %v1285_v53  ;;  %v1246_v54 = vor.u32 4788187, %v1245_v3  ;;  %v1249_v8 = vcvt.s32.f32 %v1242_v63 }
  0xf7   : > { %2824 = vmatprep.mubr.msk.f32.mxu1 %vm3110_vm13, %v3109_v17 }
  0xf8   : > { %v1247_v32 = vand.u32 2147483647, %v1246_v54 }
  0xfa   : > { %v1250_v5 = vmul.f32 %v1249_v8, %v1247_v32 }
  0xfb   : > { %v3073_v19 = vpop.eup %3072 }
  0xfc   : > { %v3075_v21 = vpop.eup %3074  ;;  %v1163_v22 = vxor.u32 2147483648, %v3073_v19  ;;  %v1251_v11 = vxor.u32 2147483648, %v1250_v5 }
  0xfd   : > { %v1160_v12 = vxor.u32 2147483648, %v3075_v21 }
  0xfe   : > { %v1164_v9 = vsel %vm1162_vm0, %v1163_v22, %v3075_v21  ;;  %v1252_v29 = vsel %vm1169_vm5, %v1251_v11, %v1250_v5 }
  0xff   : > { %v1161_v34 = vsel %vm1159_vm2, %v3073_v19, %v1160_v12  ;;  %v1255_v24 = vsel %vm1168_vm6, %v3711_v61, %v1252_v29  ;;  %v4054_v61 = vld [vmem:[%s4396_s1 + $0x28] sm:$0xff] }
 0x100   : > { %v1165_v15 = vsel %vm1158_vm3, %v1161_v34, %v1164_v9  ;;  %3076 = vcosq.f32 %v1255_v24  ;;  %2846 = vmatprep.subr.mxu0 %v4054_v61 }
 0x101   : > { %v1166_v33 = vsel %vm1155_vm4, nan, %v1165_v15  ;;  %3078 = vsinq.f32 %v1255_v24  ;;  %2847 = vmatpush3.msra.mxu0 %v4054_v61 }
 0x102   : > { %1294 = vrot.lane.b32.xlu1 %v1166_v33, %s3108_s19  ;;  %2848 = vmatprep.subr.mxu0 %v4059_v42 }
 0x103   : > { %2849 = vmatpush3.msra.mxu0 %v4059_v42 }
 0x104   : > { %2882 = vmatprep.subr.mxu0 %v3109_v17 }
 0x10c   : > { %v1287_v31 = vpop.permute.xlu1 %1286 }
 0x10d   : > { %2825 = vmatmul.mubr.msk.f32.gmra.mxu1 %vm1298_vm1, %v1287_v31  ;;  %v3077_v38 = vpop.eup %3076 }
 0x10e   : > { %2827 = vmatprep.mubr.msk.f32.mxu1 %vm3110_vm13, %v3109_v17  ;;  %v3079_v6 = vpop.eup %3078  ;;  %v1267_v62 = vxor.u32 2147483648, %v3077_v38 }
 0x10f   : > { %v1264_v30 = vxor.u32 2147483648, %v3079_v6 }
 0x110   : > { %v1268_v46 = vsel %vm1266_vm7, %v1267_v62, %v3079_v6 }
 0x111   : > { %v1265_v28 = vsel %vm1263_vm8, %v3077_v38, %v1264_v30 }
 0x112   : > { %v1269_v10 = vsel %vm1262_vm9, %v1265_v28, %v1268_v46 }
 0x113   : > { %v1270_v44 = vsel %vm1259_vm10, nan, %v1269_v10 }
 0x114   : > { %1296 = vrot.lane.b32.xlu1 %v1270_v44, %s3108_s19 }
 0x129   : > { %v1289_v43 = vpop.permute.xlu0 %1288 }
 0x12a   : > { %2828 = vmatmul.mubr.msk.f32.gmra.mxu1 %vm1298_vm1, %v1289_v43 }
 0x12b   : > { %2830 = vmatprep.mubr.msk.f32.mxu1 %vm3110_vm13, %v3109_v17 }
 0x141   : > { %v1291_v2 = vpop.permute.xlu1 %1290 }
 0x142   : > { %2831 = vmatmul.mubr.msk.f32.gmra.mxu1 %vm1298_vm1, %v1291_v2 }
 0x143   : > { %2833 = vmatprep.mubr.msk.f32.mxu1 %vm3110_vm13, %v3109_v17 }
 0x159   : > { %v1293_v26 = vpop.permute.xlu0 %1292 }
 0x15a   : > { %2834 = vmatmul.mubr.msk.f32.gmra.mxu1 %vm1298_vm1, %v1293_v26 }
 0x15b   : > { %2836 = vmatprep.mubr.msk.f32.mxu1 %vm3110_vm13, %v3109_v17 }
 0x15d   : > { %v1433_v19 = vpop.permute.xlu0 %1432 }
 0x16e   : > { %v291_v58 = vpop.f32.mrf.mxu0 }
 0x170   : > { %v2782_v60 = vpop.f32.mrf.mxu0  ;;  %v316_v25 = vpop.f32.mrf.mxu1 }
 0x172   : > { %v296_v50 = vpop.f32.mrf.mxu0  ;;  %v2797_v0 = vpop.f32.mrf.mxu1 }
 0x174   : > { %v1295_v37 = vpop.permute.xlu1 %1294  ;;  %v2785_v48 = vpop.f32.mrf.mxu0 }
 0x175   : > { %2837 = vmatmul.mubr.msk.f32.gmra.mxu1 %vm1298_vm1, %v1295_v37  ;;  %v321_v56 = vpop.f32.mrf.mxu1 }
 0x176   : > { %2839 = vmatprep.mubr.msk.f32.mxu1 %vm3110_vm13, %v3109_v17  ;;  %v301_v45 = vpop.f32.mrf.mxu0 }
 0x177   : > { %v2800_v57 = vpop.f32.mrf.mxu1 }
 0x178   : > { %v2788_v4 = vpop.f32.mrf.mxu0 }
 0x179   : > { %v326_v16 = vpop.f32.mrf.mxu1 }
 0x17a   : > { %v306_v53 = vpop.f32.mrf.mxu0 }
 0x17b   : > { %v2803_v51 = vpop.f32.mrf.mxu1 }
 0x17c   : > { %v2791_v27 = vpop.f32.mrf.mxu0 }
 0x17d   : > { %v4078_v63 = vpop.f32.mrf.mxu1 }
 0x17e   : > { %v311_v3 = vpop.f32.mrf.mxu0 }
 0x17f   : > { %v2806_v54 = vpop.f32.mrf.mxu1 }
 0x180   : > { %v2794_v8 = vpop.f32.mrf.mxu0 }
 0x186   : > { %v1297_v47 = vpop.permute.xlu1 %1296 }
 0x187   : > { %2840 = vmatmul.mubr.msk.f32.gmra.mxu1 %vm1298_vm1, %v1297_v47 }
 0x188   : > { %2870 = vmatprep.mubr.msk.f32.mxu1 %vm1298_vm1, %v291_v58 }
 0x18b   : > { %2871 = vmatmul.mubr.msk.f32.vlgmr.msra.gmra.mxu1 %vm1298_vm1, %v296_v50 }
 0x18c   : > { %2873 = vmatprep.mubr.msk.f32.mxu1 %vm1298_vm1, %v301_v45 }
 0x18f   : > { %2874 = vmatmul.mubr.msk.f32.gmra.mxu1 %vm1298_vm1, %v306_v53 }
 0x190   : > { %2876 = vmatprep.mubr.msk.f32.mxu1 %vm1298_vm1, %v311_v3 }
 0x193   : > { %2877 = vmatmul.mubr.msk.f32.gmra.mxu1 %vm1298_vm1, %v316_v25 }
 0x194   : > { %2879 = vmatprep.mubr.msk.f32.mxu1 %vm1298_vm1, %v321_v56 }
 0x197   : > { %v1383_v32 = vpop.f32.mrf.mxu1  ;;  %2880 = vmatmul.mubr.msk.f32.gmra.mxu1 %vm1298_vm1, %v326_v16 }
 0x198   : > { %v1435_v21 = vadd.f32 %v1433_v19, %v1383_v32  ;;  %2917 = vmatprep.mubr.msk.f32.mxu1 %vm3110_vm13, %v3109_v17 }
 0x199   : > { %v2817_v22 = vpop.f32.mrf.mxu1 }
 0x19a   : > { %v1443_v52 = vmax.f32 %v1435_v21, 0.0 }
 0x19c   : > { %2850 = vmatprep.mubr.msk.f32.mxu0 %vm1298_vm1, %v1443_v52 }
 0x19f   : > { %v1388_v12 = vpop.f32.mrf.mxu1 }
 0x1a0   : > { %v1436_v5 = vadd.f32 %v1433_v19, %v1388_v12 }
 0x1a1   : > { %v2820_v9 = vpop.f32.mrf.mxu1 }
 0x1a2   : > { %v1444_v23 = vmax.f32 %v1436_v5, 0.0  ;;  %v1717_v5 = vsub.s32 1, %v4001_v7 }
 0x1a4   : > { %2851 = vmatmul.mubr.msk.f32.vlgmr.msra.gmra.mxu0 %vm1298_vm1, %v1444_v23 }
 0x1b6   : > { %v1393_v34 = vpop.f32.mrf.mxu1 }
 0x1b7   : > { %v1437_v11 = vadd.f32 %v1433_v19, %v1393_v34  ;;  %v1718_v34 = vrot.slane %v3707_v41, %v1717_v5  ;;  %v3088_v41 = vld [vmem:[%s4396_s1 + $0x68] sm:$0xff] }
 0x1b8   : > { %v2823_v15 = vpop.f32.mrf.mxu1 }
 0x1b9   : > { %v1445_v33 = vmax.f32 %v1437_v11, 0.0  ;;  %v1721_v15 = vpop.permute.xlu0 %1720 }
 0x1bb   : > { %2853 = vmatprep.mubr.msk.f32.mxu0 %vm1298_vm1, %v1445_v33 }
 0x1cd   : > { %v1398_v29 = vpop.f32.mrf.mxu1 }
 0x1ce   : > { %v1438_v14 = vadd.f32 %v1433_v19, %v1398_v29 }
 0x1cf   : > { %v2826_v24 = vpop.f32.mrf.mxu1 }
 0x1d0   : > { %v1446_v36 = vmax.f32 %v1438_v14, 0.0 }
 0x1d2   : > { %2854 = vmatmul.mubr.msk.f32.gmra.mxu0 %vm1298_vm1, %v1446_v36 }
 0x1ea   : > { %v1403_v1 = vpop.f32.mrf.mxu1 }
 0x1eb   : > { %v1439_v35 = vadd.f32 %v1433_v19, %v1403_v1 }
 0x1ec   : > { %v2829_v31 = vpop.f32.mrf.mxu1 }
 0x1ed   : > { %v1447_v38 = vmax.f32 %v1439_v35, 0.0 }
 0x1ef   : > { %2856 = vmatprep.mubr.msk.f32.mxu0 %vm1298_vm1, %v1447_v38 }
 0x202   : > { %v1408_v6 = vpop.f32.mrf.mxu1 }
 0x203   : > { %v1440_v62 = vadd.f32 %v1433_v19, %v1408_v6 }
 0x204   : > { %v2832_v30 = vpop.f32.mrf.mxu1 }
 0x205   : > { %v1448_v46 = vmax.f32 %v1440_v62, 0.0 }
 0x207   : > { %2857 = vmatmul.mubr.msk.f32.gmra.mxu0 %vm1298_vm1, %v1448_v46 }
 0x21a   : > { %v1413_v28 = vpop.f32.mrf.mxu1 }
 0x21b   : > { %v1441_v10 = vadd.f32 %v1433_v19, %v1413_v28 }
 0x21c   : > { %v2835_v44 = vpop.f32.mrf.mxu1 }
 0x21d   : > { %v1449_v43 = vmax.f32 %v1441_v10, 0.0 }
 0x21f   : > { %2859 = vmatprep.mubr.msk.f32.mxu0 %vm1298_vm1, %v1449_v43 }
 0x235   : > { %v1418_v2 = vpop.f32.mrf.mxu1 }
 0x236   : > { %v1442_v26 = vadd.f32 %v1433_v19, %v1418_v2 }
 0x237   : > { %v2838_v58 = vpop.f32.mrf.mxu1 }
 0x238   : > { %v1450_v60 = vmax.f32 %v1442_v26, 0.0  ;;  %v1453_v58 = vsub.s32 3, %v4001_v7 }
 0x23a   : > { %2860 = vmatmul.mubr.msk.f32.gmra.mxu0 %vm1298_vm1, %v1450_v60  ;;  %v4192_v60 = vld [vmem:[%s4396_s1 + $0x60] sm:$0xff] }
 0x23b   : > { %2898 = vmatprep.mubr.msk.f32.mxu0 %vm3110_vm13, %v3109_v17 }
 0x247   : > { %v4103_v25 = vpop.f32.mrf.mxu1 }
 0x249   : > { %v2841_v50 = vpop.f32.mrf.mxu1 }
 0x24a   : > { %v1454_v50 = vrot.slane %v4192_v60, %v1453_v58  ;;  %v2428_v58 = vld [vmem:[%s4397_s2 + $0xa8] sm:$0xff] }
 0x24b   : > { %v2872_v0 = vpop.f32.mrf.mxu1 }
 0x24d   : > { %v1676_v37 = vpop.f32.mrf.mxu1 }
 0x24f   : > { %v2875_v56 = vpop.f32.mrf.mxu1 }
 0x251   : > { %v1686_v57 = vpop.f32.mrf.mxu1 }
 0x253   : > { %v2878_v16 = vpop.f32.mrf.mxu1 }
 0x255   : > { %v1696_v27 = vpop.f32.mrf.mxu1 }
 0x257   : > { %v2881_v3 = vpop.f32.mrf.mxu1 }
 0x259   : > { %v1706_v19 = vpop.f32.mrf.mxu1 }
 0x264   : > { %v2852_v48 = vpop.f32.mrf.mxu0 }
 0x265   : > { %v4128_v23 = vadd.f32 %v2872_v0, %v2852_v48  ;;  %v1455_v0 = vadd.f32 %v1454_v50, %v4103_v25  ;;  %v3090_v48 = vld [vmem:[%s4396_s1 + $0x50] sm:$0xff]  ;;  %v2427_v50 = vld [vmem:[%s4397_s2 + $0xa0] sm:$0xff] }
 0x266   : > { %v1547_v45 = vpop.f32.mrf.mxu0 }
 0x267   : > { %v4133_v11 = vadd.f32 %v1676_v37, %v1547_v45  ;;  %v1456_v37 = vmax.f32 %v1455_v0, 0.0  ;;  %v2426_v0 = vld [vmem:[%s4397_s2 + $0x98] sm:$0xff] }
 0x292   : > { %v2855_v4 = vpop.f32.mrf.mxu0 }
 0x293   : > { %v4119_v12 = vadd.f32 %v2875_v56, %v2855_v4 }
 0x294   : > { %v1557_v53 = vpop.f32.mrf.mxu0 }
 0x295   : > { %v1687_v9 = vadd.f32 %v1686_v57, %v1557_v53  ;;  %v2126_v53 = vsub.s32 4, %v4001_v7 }
 0x2c7   : > { %v2858_v51 = vpop.f32.mrf.mxu0 }
 0x2c8   : > { %v4109_v22 = vadd.f32 %v2878_v16, %v2858_v51  ;;  %v2127_v51 = vrot.slane %v4192_v60, %v2126_v53  ;;  %v2410_v53 = vld [vmem:[%s4397_s2 + $0x18] sm:$0xff] }
 0x2c9   : > { %v1567_v54 = vpop.f32.mrf.mxu0 }
 0x2ca   : > { %v1697_v52 = vadd.f32 %v1696_v27, %v1567_v54 }
 0x2fa   : > { %v2861_v8 = vpop.f32.mrf.mxu0 }
 0x2fb   : > { %v1712_v47 = vadd.f32 %v2881_v3, %v2861_v8 }
 0x2fc   : > { %v1577_v32 = vpop.f32.mrf.mxu0 }
 0x2fd   : > { %v4105_v21 = vadd.f32 %v1706_v19, %v1577_v32  ;;  %1822 = vrot.lane.b32.xlu1 %v1712_v47, %s3111_s9  ;;  %2883 = vmatpush3.msra.mxu0 %v1712_v47 }
 0x2fe   : > { %2884 = vmatprep.subr.mxu0 %v3109_v17 }
 0x2ff   : > { %1820 = vrot.lane.b32.xlu0 %v4105_v21, %s3111_s9  ;;  %2885 = vmatpush3.msra.mxu0 %v4105_v21 }
 0x300   : > { %2886 = vmatprep.subr.mxu0 %v3109_v17 }
 0x301   : > { %1818 = vrot.lane.b32.xlu1 %v4109_v22, %s3111_s9  ;;  %2887 = vmatpush3.msra.mxu0 %v4109_v22 }
 0x302   : > { %2888 = vmatprep.subr.mxu0 %v3109_v17 }
 0x303   : > { %1816 = vrot.lane.b32.xlu0 %v1697_v52, %s3111_s9  ;;  %2889 = vmatpush3.msra.mxu0 %v1697_v52 }
 0x304   : > { %2890 = vmatprep.subr.mxu0 %v3109_v17 }
 0x305   : > { %1814 = vrot.lane.b32.xlu1 %v4119_v12, %s3111_s9  ;;  %2891 = vmatpush3.msra.mxu0 %v4119_v12 }
 0x306   : > { %2892 = vmatprep.subr.mxu0 %v3109_v17 }
 0x307   : > { %1812 = vrot.lane.b32.xlu0 %v1687_v9, %s3111_s9  ;;  %2893 = vmatpush3.msra.mxu0 %v1687_v9 }
 0x308   : > { %2894 = vmatprep.subr.mxu0 %v3109_v17 }
 0x309   : > { %1810 = vrot.lane.b32.xlu1 %v4128_v23, %s3111_s9  ;;  %2895 = vmatpush3.msra.mxu0 %v4128_v23 }
 0x30a   : > { %2896 = vmatprep.subr.mxu0 %v3109_v17 }
 0x30b   : > { %1723 = vrot.lane.b32.xlu0 %v1718_v34, %s3111_s9  ;;  %2897 = vmatpush3.msra.mxu0 %v4133_v11 }
 0x30c   : > { %2899 = vmatmul.mubr.msk.f32.vlgmr.msra.gmra.mxu0 %vm1726_vm11, %v1721_v15  ;;  %2920 = vmatprep.subr.mxu0 %v3109_v17 }
 0x30d   : > { %1808 = vrot.lane.b32.xlu1 %v4133_v11, %s3111_s9  ;;  %2936 = vmatprep.mubr.msk.f32.mxu0 %vm3110_vm13, %v3109_v17 }
 0x30f   : > { %1825 = vrot.lane.b32.xlu0 %v3088_v41, %s3112_s25 }
 0x313   : > { %1942 = vrot.lane.b32.xlu0 %v1712_v47, %s3112_s25 }
 0x317   : > { %1936 = vrot.lane.b32.xlu0 %v1697_v52, %s3112_s25 }
 0x31b   : > { %1932 = vrot.lane.b32.xlu0 %v1687_v9, %s3112_s25 }
 0x36f   : > { %v1823_v33 = vpop.permute.xlu1 %1822 }
 0x370   : > { %2902 = vmatpush3.xpose.msk.msra.mxu1 %vm1298_vm1, %v1823_v33 }
 0x371   : > { %v1821_v29 = vpop.permute.xlu0 %1820  ;;  %2903 = vmatprep.subr.mxu1 %v3109_v17 }
 0x373   : > { %v1819_v24 = vpop.permute.xlu1 %1818 }
 0x374   : > { %2904 = vmatpush3.xpose.msk.msra.mxu1 %vm1298_vm1, %v1821_v29 }
 0x375   : > { %v1817_v14 = vpop.permute.xlu0 %1816  ;;  %2905 = vmatprep.subr.mxu1 %v3109_v17 }
 0x377   : > { %v1815_v35 = vpop.permute.xlu1 %1814 }
 0x378   : > { %2906 = vmatpush3.xpose.msk.msra.mxu1 %vm1298_vm1, %v1819_v24 }
 0x379   : > { %v1813_v36 = vpop.permute.xlu0 %1812  ;;  %2907 = vmatprep.subr.mxu1 %v3109_v17 }
 0x37b   : > { %v1811_v38 = vpop.permute.xlu1 %1810 }
 0x37c   : > { %2908 = vmatpush3.xpose.msk.msra.mxu1 %vm1298_vm1, %v1817_v14 }
 0x37d   : > { %v1724_v1 = vpop.permute.xlu0 %1723  ;;  %2909 = vmatprep.subr.mxu1 %v3109_v17 }
 0x37f   : > { %v1809_v62 = vpop.permute.xlu1 %1808 }
 0x380   : > { %2910 = vmatpush3.xpose.msk.msra.mxu1 %vm1298_vm1, %v1815_v35  ;;  %v2438_v35 = vld [vmem:[%s4397_s2 + $0xf8] sm:$0xff] }
 0x381   : > { %v1826_v31 = vpop.permute.xlu0 %1825  ;;  %2911 = vmatprep.subr.mxu1 %v3109_v17 }
 0x384   : > { %2912 = vmatpush3.xpose.msk.msra.mxu1 %vm1298_vm1, %v1813_v36 }
 0x385   : > { %v1943_v6 = vpop.permute.xlu0 %1942  ;;  %2913 = vmatprep.subr.mxu1 %v3109_v17 }
 0x386   : > { %2921 = vmatpush3.msra.mxu0 %v1943_v6  ;;  %v2436_v6 = vld [vmem:[%s4397_s2 + $0xe8] sm:$0xff] }
 0x387   : > { %2922 = vmatprep.subr.mxu0 %v3109_v17 }
 0x388   : > { %2914 = vmatpush3.xpose.msk.msra.mxu1 %vm1298_vm1, %v1811_v38  ;;  %v2437_v38 = vld [vmem:[%s4397_s2 + $0xf0] sm:$0xff] }
 0x389   : > { %2915 = vmatprep.subr.mxu1 %v3109_v17 }
 0x38c   : > { %2916 = vmatpush3.xpose.msk.msra.mxu1 %vm1298_vm1, %v1809_v62  ;;  %v2435_v62 = vld [vmem:[%s4397_s2 + $0xe0] sm:$0xff] }
 0x38d   : > { %2950 = vmatprep.subr.mxu1 %v3109_v17 }
 0x3cc   : > { %v1795_v30 = vpop.f32.mrf.mxu0 }
 0x3cd   : > { %v4171_v46 = vadd.f32 %v1795_v30, %v1724_v1  ;;  %v2434_v30 = vld [vmem:[%s4397_s2 + $0xd8] sm:$0xff] }
 0x3ce   : > { %v2900_v28 = vpop.f32.mrf.mxu0 }
 0x3cf   : > { %v1799_v10 = vmax.f32 %v4171_v46, 0.0  ;;  %v2433_v28 = vld [vmem:[%s4397_s2 + $0xd0] sm:$0xff] }
 0x3d1   : > { %2918 = vmatmul.mubr.msk.f32.vlgmr.msra.gmra.mxu1 %vm1298_vm1, %v1799_v10 }
 0x3d2   : > { %2958 = vmatprep.mubr.msk.f32.mxu1 %vm3110_vm13, %v3109_v17 }
 0x491   : > { %v1913_v44 = vpop.f32.mrf.mxu1 }
 0x492   : > { %v1914_v43 = vadd.f32 %v1913_v44, %v1826_v31  ;;  %v2432_v44 = vld [vmem:[%s4397_s2 + $0xc8] sm:$0xff] }
 0x493   : > { %v2919_v2 = vpop.f32.mrf.mxu1 }
 0x494   : > { %v1917_v26 = vsel %vm1726_vm11, %v1914_v43, -inf  ;;  %v2430_v2 = vld [vmem:[%s4397_s2 + $0xb8] sm:$0xff] }
 0x495   : > { %1918 = vmax.xlane.f32.xlu1 %v1917_v26  ;;  %v2429_v26 = vld [vmem:[%s4397_s2 + $0xb0] sm:$0xff] }
 0x4a6   : > { %1940 = vrot.lane.b32.xlu1 %v4105_v21, %s3112_s25 }
 0x4aa   : > { %1938 = vrot.lane.b32.xlu1 %v4109_v22, %s3112_s25 }
 0x4ae   : > { %1934 = vrot.lane.b32.xlu1 %v4119_v12, %s3112_s25 }
 0x4b2   : > { %1930 = vrot.lane.b32.xlu1 %v4128_v23, %s3112_s25  ;;  %v2027_v23 = vsub.s32 2, %v4001_v7 }
 0x4b4   : > { %v2028_v34 = vrot.slane %v4192_v60, %v2027_v23 }
 0x4b6   : > { %2141 = vrot.lane.b32.xlu1 %v4040_v20, %s3113_s30  ;;  %v3091_v20 = vld [vmem:[%s4396_s1 + $0x58] sm:$0xff] }
 0x4ba   : > { %2137 = vrot.lane.b32.xlu1 %v4054_v61, %s3113_s30 }
 0x4be   : > { %2129 = vrot.lane.b32.xlu1 %v1456_v37, %s3111_s9  ;;  %v2425_v37 = vld [vmem:[%s4397_s2 + $0x90] sm:$0xff] }
 0x4c2   : > { %2037 = vrot.lane.b32.xlu1 %v3996_v40, %s3113_s30 }
 0x4c6   : > { %2033 = vrot.lane.b32.xlu1 %v4025_v49, %s3113_s30 }
 0x4ca   : > { %2232 = vrot.lane.b32.xlu1 %v3090_v48, %s3113_s30 }
 0x4ce   : > { %2230 = vrot.lane.b32.xlu1 %v3792_v13, %s3113_s30  ;;  %v1937_v13 = vpop.permute.xlu0 %1936 }
 0x4d2   : > { %2319 = vrot.lane.b32.xlu1 %v3091_v20, %s3112_s25  ;;  %v1933_v45 = vpop.permute.xlu0 %1932 }
 0x4d6   : > { %2317 = vrot.lane.b32.xlu1 %v3090_v48, %s3112_s25  ;;  %v2424_v48 = vld [vmem:[%s4397_s2 + $0x88] sm:$0xff] }
 0x4da   : > { %2313 = vrot.lane.b32.xlu1 %v3810_v55, %s3112_s25 }
 0x4de   : > { %2512 = vrot.lane.b32.xlu1 %v4078_v63, %s3113_s30 }
 0x51e   : > { %v1919_v40 = vpop.xlane.xlu1 %1918 }
 0x51f   : > { %v1920_v49 = vsub.f32 %v1914_v43, %v1919_v40  ;;  %v2431_v43 = vld [vmem:[%s4397_s2 + $0xc0] sm:$0xff]  ;;  %v2422_v40 = vld [vmem:[%s4397_s2 + $0x78] sm:$0xff] }
 0x521   : > { %v1921_v61 = vmul.f32 1.442695, %v1920_v49  ;;  %v2421_v49 = vld [vmem:[%s4397_s2 + $0x70] sm:$0xff] }
 0x522   : > { %v1941_v25 = vpop.permute.xlu1 %1940 }
 0x523   : > { %3080 = vpow2.f32 %v1921_v61  ;;  %2923 = vmatpush3.msra.mxu0 %v1941_v25  ;;  %v2420_v61 = vld [vmem:[%s4397_s2 + $0x68] sm:$0xff]  ;;  %v2419_v25 = vld [vmem:[%s4397_s2 + $0x60] sm:$0xff] }
 0x524   : > { %2924 = vmatprep.subr.mxu0 %v3109_v17 }
 0x526   : > { %v1939_v56 = vpop.permute.xlu1 %1938 }
 0x527   : > { %2925 = vmatpush3.msra.mxu0 %v1939_v56  ;;  %v2417_v56 = vld [vmem:[%s4397_s2 + $0x50] sm:$0xff] }
 0x528   : > { %2926 = vmatprep.subr.mxu0 %v3109_v17 }
 0x529   : > { %2927 = vmatpush3.msra.mxu0 %v1937_v13  ;;  %v2418_v13 = vld [vmem:[%s4397_s2 + $0x58] sm:$0xff] }
 0x52a   : > { %2928 = vmatprep.subr.mxu0 %v3109_v17  ;;  %v1935_v55 = vpop.permute.xlu1 %1934 }
 0x52b   : > { %2929 = vmatpush3.msra.mxu0 %v1935_v55  ;;  %v2416_v55 = vld [vmem:[%s4397_s2 + $0x48] sm:$0xff] }
 0x52c   : > { %2930 = vmatprep.subr.mxu0 %v3109_v17 }
 0x52d   : > { %2931 = vmatpush3.msra.mxu0 %v1933_v45  ;;  %v2415_v45 = vld [vmem:[%s4397_s2 + $0x40] sm:$0xff] }
 0x52e   : > { %2932 = vmatprep.subr.mxu0 %v3109_v17  ;;  %v1931_v63 = vpop.permute.xlu1 %1930 }
 0x52f   : > { %2933 = vmatpush3.msra.mxu0 %v1931_v63  ;;  %v2414_v63 = vld [vmem:[%s4397_s2 + $0x38] sm:$0xff] }
 0x530   : > { %v3081_v57 = vpop.eup %3080  ;;  %2934 = vmatprep.subr.mxu0 %v3109_v17 }
 0x531   : > { %v1923_v4 = vsel %vm1726_vm11, %v3081_v57, 0.0 }
 0x532   : > { %1924 = vadd.xlane.f32.xlu0 %v1923_v4  ;;  %v2142_v16 = vpop.permute.xlu1 %2141  ;;  %v2412_v4 = vld [vmem:[%s4397_s2 + $0x28] sm:$0xff] }
 0x533   : > { %2951 = vmatpush3.msra.mxu1 %v2142_v16  ;;  %v2411_v16 = vld [vmem:[%s4397_s2 + $0x20] sm:$0xff] }
 0x534   : > { %2952 = vmatprep.subr.mxu1 %v3109_v17 }
 0x548   : > { %1928 = vrot.lane.b32.xlu0 %v4133_v11, %s3112_s25  ;;  %v3093_v11 = vld [vmem:[%s4396_s1 + $0x48] sm:$0xff] }
 0x54c   : > { %2139 = vrot.lane.b32.xlu0 %v4045_v39, %s3113_s30  ;;  %v3092_v39 = vld [vmem:[%s4396_s1 + $0x40] sm:$0xff] }
 0x550   : > { %2135 = vrot.lane.b32.xlu0 %v4059_v42, %s3113_s30  ;;  %v2138_v42 = vpop.permute.xlu1 %2137 }
 0x554   : > { %2039 = vrot.lane.b32.xlu0 %v3990_v59, %s3113_s30  ;;  %v2130_v27 = vpop.permute.xlu1 %2129 }
 0x558   : > { %2035 = vrot.lane.b32.xlu0 %v4020_v18, %s3113_s30  ;;  %v2038_v59 = vpop.permute.xlu1 %2037 }
 0x55c   : > { %2234 = vrot.lane.b32.xlu0 %v3091_v20, %s3113_s30  ;;  %v2034_v3 = vpop.permute.xlu1 %2033  ;;  %v2423_v20 = vld [vmem:[%s4397_s2 + $0x80] sm:$0xff] }
 0x560   : > { %2148 = vrot.lane.b32.xlu0 %v2127_v51, %s3111_s9  ;;  %v2233_v54 = vpop.permute.xlu1 %2232  ;;  %v2409_v51 = vld [vmem:[%s4397_s2 + $0x10] sm:$0xff] }
 0x564   : > { %2228 = vrot.lane.b32.xlu0 %v3092_v39, %s3113_s30  ;;  %v2231_v8 = vpop.permute.xlu1 %2230  ;;  %v2408_v39 = vld [vmem:[%s4397_s2 + $0x8] sm:$0xff] }
 0x568   : > { %v2320_v32 = vpop.permute.xlu1 %2319  ;;  %2046 = vrot.lane.b32.xlu0 %v2028_v34, %s3111_s9 }
 0x56c   : > { %v2318_v12 = vpop.permute.xlu1 %2317  ;;  %2315 = vrot.lane.b32.xlu0 %v3093_v11, %s3112_s25 }
 0x5bb   : > { %v1925_v18 = vpop.xlane.xlu0 %1924 }
 0x5bc   : > { %3082 = vrcp.f32 %v1925_v18  ;;  %v2400_v18 = vsub.s32 5, %v4001_v7 }
 0x5bf   : > { %v1929_v47 = vpop.permute.xlu0 %1928 }
 0x5c0   : > { %2935 = vmatpush3.msra.mxu0 %v1929_v47 }
 0x5c1   : > { %2939 = vmatprep.subr.mxu0 %v3109_v17 }
 0x5c3   : > { %v2140_v19 = vpop.permute.xlu0 %2139 }
 0x5c4   : > { %2953 = vmatpush3.msra.mxu1 %v2140_v19 }
 0x5c5   : > { %2954 = vmatprep.subr.mxu1 %v3109_v17 }
 0x5c6   : > { %2955 = vmatpush3.msra.mxu1 %v2138_v42  ;;  %v2407_v42 = vld [vmem:[%s4397_s2] sm:$0xff] }
 0x5c7   : > { %v2136_v21 = vpop.permute.xlu0 %2135  ;;  %2956 = vmatprep.subr.mxu1 %v3109_v17 }
 0x5c8   : > { %2957 = vmatpush3.msra.mxu1 %v2136_v21 }
 0x5c9   : > { %v3083_v22 = vpop.eup %3082  ;;  %2959 = vmatmul.mubr.msk.f32.vlgmr.msra.gmra.mxu1 %vm1298_vm1, %v2130_v27  ;;  %2972 = vmatprep.subr.mxu1 %v3109_v17  ;;  %v196_v27 = vld [vmem:[%s3148_s18 + $0x48] sm:$0xff]  ;;  %s2987_s18 = smul.u32 24, %s4416_s13 }
 0x5ca   : > { %v1927_v52 = vmul.f32 %v3083_v22, %v3081_v57  ;;  %2973 = vmatpush3.msra.mxu1 %v2320_v32  ;;  %2980 = vmatprep.mubr.msk.f32.mxu1 %vm3110_vm13, %v3109_v17  ;;  %v2413_v57 = vld [vmem:[%s4397_s2 + $0x30] sm:$0xff] }
 0x5cb   : > { %v2040_v5 = vpop.permute.xlu0 %2039  ;;  %2974 = vmatprep.subr.mxu1 %v3109_v17  ;;  %s172_s14 = scalar_lea.vmem %s4398_s3, %s2987_s18 }
 0x5cc   : > { %2937 = vmatmul.mubr.msk.f32.vlgmr.msra.gmra.mxu0 %vm1726_vm11, %v1927_v52  ;;  %2975 = vmatpush3.msra.mxu1 %v2318_v12 }
 0x5cd   : > { %2940 = vmatpush3.msra.mxu0 %v2040_v5  ;;  %2947 = vmatprep.mubr.msk.f32.mxu0 %vm3110_vm13, %v3109_v17 }
 0x5ce   : > { %2941 = vmatprep.subr.mxu0 %v3109_v17  ;;  %2976 = vmatprep.subr.mxu1 %v3109_v17 }
 0x5cf   : > { %2942 = vmatpush3.msra.mxu0 %v2038_v59  ;;  %v2036_v9 = vpop.permute.xlu0 %2035 }
 0x5d0   : > { %2943 = vmatprep.subr.mxu0 %v3109_v17 }
 0x5d1   : > { %2944 = vmatpush3.msra.mxu0 %v2036_v9 }
 0x5d2   : > { %2945 = vmatprep.subr.mxu0 %v3109_v17 }
 0x5d3   : > { %2946 = vmatpush3.msra.mxu0 %v2034_v3  ;;  %v2235_v15 = vpop.permute.xlu0 %2234 }
 0x5d4   : > { %2961 = vmatprep.subr.mxu0 %v3109_v17 }
 0x5d7   : > { %v2149_v29 = vpop.permute.xlu0 %2148 }
 0x5db   : > { %v2229_v1 = vpop.permute.xlu0 %2228 }
 0x5df   : > { %v2047_v59 = vpop.permute.xlu0 %2046 }
 0x5e3   : > { %v2316_v3 = vpop.permute.xlu0 %2315 }
 0x5e4   : > { %2977 = vmatpush3.msra.mxu1 %v2316_v3 }
 0x5e5   : > { %2978 = vmatprep.subr.mxu1 %v3109_v17 }
 0x689   : > { %v2219_v41 = vpop.f32.mrf.mxu1 }
 0x68a   : > { %v2220_v36 = vadd.f32 %v2219_v41, %v2149_v29 }
 0x68b   : > { %v2960_v33 = vpop.f32.mrf.mxu1 }
 0x68c   : > { %v2021_v14 = vpop.f32.mrf.mxu0  ;;  %v2223_v31 = vmax.f32 %v2220_v36, 0.0 }
 0x68d   : > { %2948 = vmatmul.mubr.msk.f32.vlgmr.msra.gmra.mxu0 %vm1298_vm1, %v2021_v14 }
 0x68e   : > { %2962 = vmatpush3.msra.mxu0 %v2235_v15  ;;  %v2938_v24 = vpop.f32.mrf.mxu0  ;;  %2969 = vmatprep.mubr.msk.f32.mxu0 %vm3110_vm13, %v3109_v17  ;;  %vm2527_vm13 = vcmask 1048064  }
 0x68f   : > { %2963 = vmatprep.subr.mxu0 %v3109_v17 }
 0x690   : > { %2964 = vmatpush3.msra.mxu0 %v2233_v54  ;;  %v2314_v54 = vpop.permute.xlu1 %2313 }
 0x691   : > { %2965 = vmatprep.subr.mxu0 %v3109_v17  ;;  %2979 = vmatpush3.msra.mxu1 %v2314_v54 }
 0x692   : > { %2966 = vmatpush3.msra.mxu0 %v2231_v8  ;;  %v2401_v8 = vrot.slane %v4192_v60, %v2400_v18 }
 0x693   : > { %2967 = vmatprep.subr.mxu0 %v3109_v17 }
 0x694   : > { %2968 = vmatpush3.msra.mxu0 %v2229_v1  ;;  %2403 = vrot.lane.b32.xlu0 %v2401_v8, %s3111_s9  ;;  %v2513_v9 = vpop.permute.xlu1 %2512 }
 0x695   : > { %2970 = vmatmul.mubr.msk.f32.vlgmr.msra.gmra.mxu0 %vm1298_vm1, %v2223_v31  ;;  %2439 = vmatprep.subr.mxu0 %v2438_v35 }
 0x696   : > { %2440 = vmatpush1.msra.mxu0 %v2437_v38  ;;  %2503 = vmatprep.mubr.f32.mxu0 %v3109_v17 }
 0x697   : > { %2441 = vmatprep.subr.mxu0 %v2436_v6 }
 0x698   : > { %2442 = vmatpush1.msra.mxu0 %v2435_v62 }
 0x699   : > { %2443 = vmatprep.subr.mxu0 %v2434_v30 }
 0x69a   : > { %2444 = vmatpush1.msra.mxu0 %v2433_v28 }
 0x69b   : > { %2445 = vmatprep.subr.mxu0 %v2432_v44 }
 0x69c   : > { %2446 = vmatpush1.msra.mxu0 %v2431_v43 }
 0x69d   : > { %2447 = vmatprep.subr.mxu0 %v2430_v2 }
 0x69e   : > { %2448 = vmatpush1.msra.mxu0 %v2429_v26 }
 0x69f   : > { %2449 = vmatprep.subr.mxu0 %v2428_v58 }
 0x6a0   : > { %2450 = vmatpush1.msra.mxu0 %v2427_v50 }
 0x6a1   : > { %2451 = vmatprep.subr.mxu0 %v2426_v0 }
 0x6a2   : > { %2452 = vmatpush1.msra.mxu0 %v2425_v37 }
 0x6a3   : > { %2453 = vmatprep.subr.mxu0 %v2424_v48 }
 0x6a4   : > { %2454 = vmatpush1.msra.mxu0 %v2423_v20 }
 0x6a5   : > { %2455 = vmatprep.subr.mxu0 %v2422_v40 }
 0x6a6   : > { %2456 = vmatpush1.msra.mxu0 %v2421_v49 }
 0x6a7   : > { %2457 = vmatprep.subr.mxu0 %v2420_v61 }
 0x6a8   : > { %2458 = vmatpush1.msra.mxu0 %v2419_v25 }
 0x6a9   : > { %2459 = vmatprep.subr.mxu0 %v2418_v13 }
 0x6aa   : > { %2460 = vmatpush1.msra.mxu0 %v2417_v56 }
 0x6ab   : > { %2461 = vmatprep.subr.mxu0 %v2416_v55 }
 0x6ac   : > { %2462 = vmatpush1.msra.mxu0 %v2415_v45 }
 0x6ad   : > { %2463 = vmatprep.subr.mxu0 %v2414_v63 }
 0x6ae   : > { %2464 = vmatpush1.msra.mxu0 %v2413_v57 }
 0x6af   : > { %2465 = vmatprep.subr.mxu0 %v2412_v4 }
 0x6b0   : > { %2466 = vmatpush1.msra.mxu0 %v2411_v16 }
 0x6b1   : > { %2467 = vmatprep.subr.mxu0 %v2410_v53 }
 0x6b2   : > { %2468 = vmatpush1.msra.mxu0 %v2409_v51 }
 0x6b3   : > { %2469 = vmatprep.subr.mxu0 %v2408_v39 }
 0x6b4   : > { %2470 = vmatpush1.msra.mxu0 %v2407_v42 }
 0x6b5   : > { %2504 = vmatmul.mubr.f32.vlgmr.msra.gmra.mxu0 %v196_v27 }
 0x706   : > { %v2404_v60 = vpop.permute.xlu0 %2403 }
 0x74d   : > { %v2118_v47 = vpop.f32.mrf.mxu0 }
 0x74e   : > { %v2119_v19 = vadd.f32 %v2118_v47, %v2047_v59 }
 0x74f   : > { %v2949_v32 = vpop.f32.mrf.mxu0 }
 0x750   : > { %v2122_v21 = vmax.f32 %v2119_v19, 0.0 }
 0x752   : > { %v2123_v22 = vadd.f32 %v2122_v21, %v1799_v10 }
 0x754   : > { %2981 = vmatmul.mubr.msk.f32.vlgmr.msra.gmra.mxu1 %vm1298_vm1, %v2123_v22 }
 0x755   : > { %v2309_v52 = vpop.f32.mrf.mxu0 }
 0x757   : > { %v2971_v12 = vpop.f32.mrf.mxu0 }
 0x775   : > { %v2505_v5 = vpop.f32.mrf.mxu0 }
 0x776   : > { %2519 = vrot.lane.b32.xlu0 %v2505_v5, %s3112_s25 }
 0x777   : > { %v2507_v7 = vpop.f32.mrf.mxu0 }
 0x778   : > { %2521 = vrot.lane.b32.xlu1 %v2507_v7, %s3112_s25 }
 0x7e8   : > { %v2520_v46 = vpop.permute.xlu0 %2519 }
 0x7ea   : > { %v2522_v10 = vpop.permute.xlu1 %2521 }
 0x7eb   : > { %v2523_v23 = vsel %vm1726_vm11, %v2520_v46, %v2522_v10  ;;  %2530 = vst.msk [vmem:[%s172_s14 + $0x10] sm:$0xff] %vm1726_vm11, %v2522_v10 }
 0x7ec   : > { %2529 = vst [vmem:[%s172_s14 + $0x8] sm:$0xff] %v2523_v23  ;;  %2531 = vst.msk [vmem:[%s172_s14 + $0x10] sm:$0xff] %vm2527_vm13, %v3109_v17 }
 0x814   : > { %v2394_v34 = vpop.f32.mrf.mxu1 }
 0x815   : > { %v2395_v11 = vadd.f32 %v2394_v34, %v2309_v52 }
 0x816   : > { %v2982_v15 = vpop.f32.mrf.mxu1 }
 0x817   : > { %v2406_v41 = vadd.f32 %v2404_v60, %v2395_v11 }
 0x819   : > { %2510 = vst.msk [vmem:[%s172_s14] sm:$0xff] %vm1298_vm1, %v2406_v41 }
 0x81a   : > { %2516 = vst.msk [vmem:[%s172_s14] sm:$0xff] %vm2515_vm12, %v2513_v9 }
 0x81b   : > { %2528 = vst.msk [vmem:[%s172_s14] sm:$0xff] %vm2527_vm13, %v2520_v46 }
 0x81c PF: > { %s13_s12 = sadd.s32 1, %s3100_s12  }
 0x81d   : > { %p10_p5 = scmp.ge.s32.totalorder %s13_s12, 6  }
 0x81f   :  { %12 = sbr.rel (!%p10_p5) target bundleno = 1 (0x1), region = 62 }

</bundles_post_ra>
